<compile_context>
chip_gen: v7x
topology: tpu7x:2x2x1
jax: 0.10.0
libtpu: 0.0.40
codegen_flags: <defaults>
</compile_context>

<pallas_src>
import math
import functools

import jax
import jax.numpy as jnp
from jax.experimental import pallas as pl
from jax.experimental.pallas import tpu as pltpu

# ---------------- hyper-parameters (small, synthetic) ----------------
N_HEADS = 4
DIM_INPUT = 32
DIM_HEAD = 8           # dim_head_inner ; N_HEADS * DIM_HEAD == DIM_INPUT
DIM_FF = 64            # dim_ff_inner
BG = 0.1               # gating bias of GatingMechanism
EPS = 1e-5             # torch.nn.LayerNorm default eps
T_SEQ = 8
M_MEM = 4
BATCH = 2


# ============================ fused Pallas kernel ============================

def _fused_layer_kernel(T, M, H, D, scale, bg,
                        x_ref, mem_ref, pos_ref, u_ref, v_ref,
                        ln1_g, ln1_b,
                        w_q, w_kv, w_pos, w_out,
                        g1_w, g1_bw, g1_u, g1_bu, g1_ug, g1_bug,
                        ln2_g, ln2_b,
                        ff_w1, ff_b1, ff_w2, ff_b2,
                        g2_w, g2_bw, g2_u, g2_bu, g2_ug, g2_bug,
                        o_ref):
    """One grid step == one batch element. Everything stays in VMEM/vregs."""
    J = T + M
    HD = H * D
    x = x_ref[0]            # (T, Din)   raw encoder input for this batch
    mem = mem_ref[0]        # (M, Din)   raw memory for this batch
    Din = x.shape[-1]

    def layer_norm(h, g_r, b_r):
        mu = jnp.mean(h, axis=-1, keepdims=True)
        var = jnp.mean((h - mu) ** 2, axis=-1, keepdims=True)
        return (h - mu) * jax.lax.rsqrt(var + EPS) * g_r[...] + b_r[...]

    # ---- norm1 ----
    src2 = layer_norm(x, ln1_g, ln1_b)                                    # (T, Din)

    # ---- projections (weights are VMEM-resident) ----
    q = jnp.dot(src2, w_q[...], preferred_element_type=jnp.float32)      # (T, H*D)
    kv_cur = jnp.dot(src2, w_kv[...], preferred_element_type=jnp.float32)   # (T, 2*H*D)
    kv_mem = jnp.dot(mem, w_kv[...], preferred_element_type=jnp.float32)    # (M, 2*H*D)
    pos = jnp.dot(pos_ref[...], w_pos[...], preferred_element_type=jnp.float32)  # (J, H*D)

    # fold 1/sqrt(D) into the queries (removes the per-logit scale later)
    qu = (q + u_ref[...]) * scale                                         # (T, H*D)
    qv = (q + v_ref[...]) * scale                                         # (T, H*D)

    # keys / values over j = [memory ; current]
    k_all = jnp.concatenate([kv_mem[:, :HD], kv_cur[:, :HD]], axis=0)     # (J, H*D)
    v_all = jnp.concatenate([kv_mem[:, HD:], kv_cur[:, HD:]], axis=0)     # (J, H*D)

    # ---- per-head attention scores (rows stacked as (h, t)) ----
    nt = (((1,), (1,)), ((), ()))      # contract last dims: A @ B^T
    content_blocks = []
    pos_blocks = []
    for h in range(H):
        cs = slice(h * D, (h + 1) * D)
        content_blocks.append(
            jax.lax.dot_general(qu[:, cs], k_all[:, cs], nt,
                                preferred_element_type=jnp.float32))      # (T, J)
        pos_blocks.append(
            jax.lax.dot_general(qv[:, cs], pos[:, cs], nt,
                                preferred_element_type=jnp.float32))      # (T, J)
    content = jnp.concatenate(content_blocks, axis=0)                     # (H*T, J)
    p = jnp.concatenate(pos_blocks, axis=0)                               # (H*T, J)

    # ---- rel_shift, done in-kernel ----
    # Exact semantics of the pad/reshape/slice trick:
    #   out[t, j] = p[t, j+T-1-t]        if j <= M+t
    #             = 0                    if j == M+t+1
    #             = p[t+1, j-M-t-2]      if j >  M+t+1
    # Realised as: extend each row with [zero | next row] and take a static column
    # window of width J whose start depends only on t (selected with a masked where).
    p_next = jnp.concatenate([p[1:], p[:1]], axis=0)                      # row r -> row r+1
    p_ext = jnp.concatenate(
        [p, jnp.zeros((H * T, 1), jnp.float32), p_next], axis=1)          # (H*T, 2J+1)
    row_t = jax.lax.broadcasted_iota(jnp.int32, (H * T, J), 0) % T
    p_shift = jnp.zeros((H * T, J), jnp.float32)
    for t in range(T):
        sh = T - 1 - t
        p_shift = jnp.where(row_t == t, p_ext[:, sh:sh + J], p_shift)

    # ---- softmax over keys (scale already folded into q) ----
    logits = content + p_shift
    mmax = jnp.max(logits, axis=-1, keepdims=True)
    e = jnp.exp(logits - mmax)
    attn = e * pl.reciprocal(jnp.sum(e, axis=-1, keepdims=True), approx=True)  # (H*T, J)

    # ---- attention * values, re-assembled to (T, H*D) ----
    av_blocks = []
    for h in range(H):
        cs = slice(h * D, (h + 1) * D)
        av_blocks.append(jnp.dot(attn[h * T:(h + 1) * T, :], v_all[:, cs],
                                 preferred_element_type=jnp.float32))     # (T, D)
    av = jnp.concatenate(av_blocks, axis=1)                               # (T, H*D)
    attn_out = jnp.dot(av, w_out[...], preferred_element_type=jnp.float32)  # (T, Din)

    # ---- GRU-style gate (weights pre-concatenated: [Wr|Wz|Wg], [Ur|Uz]) ----
    def gate(xg, yg, wc, bwc, uc, buc, ug, bug_):
        wy = jnp.dot(yg, wc[...], preferred_element_type=jnp.float32) + bwc[...]   # (T, 3*Din)
        ux = jnp.dot(xg, uc[...], preferred_element_type=jnp.float32) + buc[...]   # (T, 2*Din)
        r = jax.nn.sigmoid(wy[:, :Din] + ux[:, :Din])
        z = jax.nn.sigmoid(wy[:, Din:2 * Din] + ux[:, Din:2 * Din] - bg)
        hc = jnp.tanh(wy[:, 2 * Din:]
                      + jnp.dot(r * xg, ug[...], preferred_element_type=jnp.float32)
                      + bug_[...])
        return (1.0 - z) * xg + z * hc

    src = gate(x, attn_out, g1_w, g1_bw, g1_u, g1_bu, g1_ug, g1_bug)

    # ---- norm2 + position-wise FF ----
    src_n = layer_norm(src, ln2_g, ln2_b)
    hff = jnp.maximum(
        jnp.dot(src_n, ff_w1[...], preferred_element_type=jnp.float32) + ff_b1[...], 0.0)
    ff = jnp.dot(hff, ff_w2[...], preferred_element_type=jnp.float32) + ff_b2[...]

    # ---- gate 2 ----
    out = gate(src, ff, g2_w, g2_bw, g2_u, g2_bu, g2_ug, g2_bug)
    o_ref[0] = out


# ============================ wrapper ============================

def stable_transformer_encoder_layer_xl(kparams, encode_input, pos_emb, u, v, memory):
    T, B, Din = encode_input.shape
    M = memory.shape[0]
    H, D = N_HEADS, DIM_HEAD
    HD = H * D
    scale = 1.0 / math.sqrt(D)

    # batch-major 2-D internal layout so all in-kernel slices are static & contiguous
    x_bm = jnp.transpose(encode_input, (1, 0, 2))     # (B, T, Din)
    mem_bm = jnp.transpose(memory, (1, 0, 2))         # (B, M, Din)
    u2 = u.reshape(1, HD)
    v2 = v.reshape(1, HD)

    weights = [
        kparams['ln1_g'], kparams['ln1_b'],
        kparams['w_q'], kparams['w_kv'], kparams['w_pos'], kparams['w_out'],
        kparams['g1_w'], kparams['g1_bw'], kparams['g1_u'], kparams['g1_bu'],
        kparams['g1_ug'], kparams['g1_bug'],
        kparams['ln2_g'], kparams['ln2_b'],
        kparams['ff_w1'], kparams['ff_b1'], kparams['ff_w2'], kparams['ff_b2'],
        kparams['g2_w'], kparams['g2_bw'], kparams['g2_u'], kparams['g2_bu'],
        kparams['g2_ug'], kparams['g2_bug'],
    ]

    def _const_spec(arr):
        return pl.BlockSpec(arr.shape, lambda b: (0,) * arr.ndim)

    in_specs = ([pl.BlockSpec((1, T, Din), lambda b: (b, 0, 0)),
                 pl.BlockSpec((1, M, Din), lambda b: (b, 0, 0)),
                 _const_spec(pos_emb), _const_spec(u2), _const_spec(v2)]
                + [_const_spec(w) for w in weights])

    kernel = functools.partial(_fused_layer_kernel, T, M, H, D, scale, BG)

    out_bm = pl.pallas_call(
        kernel,
        out_shape=jax.ShapeDtypeStruct((B, T, Din), jnp.float32),
        grid=(B,),
        in_specs=in_specs,
        out_specs=pl.BlockSpec((1, T, Din), lambda b: (b, 0, 0)),
        compiler_params=pltpu.CompilerParams(
            dimension_semantics=("parallel",)),        # v7x: one batch per TensorCore
    )(x_bm, mem_bm, pos_emb, u2, v2, *weights)

    return jnp.transpose(out_bm, (1, 0, 2))            # back to (T, B, Din)


# ============================ parameter init ============================

def _linear_params(key, in_f, out_f, bias=True):
    kw, kb = jax.random.split(key)
    bound = 1.0 / math.sqrt(in_f)
    # weight stored pre-transposed as (in_f, out_f) so kernels do x @ W
    wt = jax.random.uniform(kw, (in_f, out_f), jnp.float32, -bound, bound)
    if bias:
        b = jax.random.uniform(kb, (1, out_f), jnp.float32, -bound, bound)
        return wt, b
    return wt, None


def _init_gate(key, din):
    ks = jax.random.split(key, 6)
    wr, br = _linear_params(ks[0], din, din)
    ur, bur = _linear_params(ks[1], din, din)
    wz, bz = _linear_params(ks[2], din, din)
    uz, buz = _linear_params(ks[3], din, din)
    wg, bgw = _linear_params(ks[4], din, din)
    ug, bug = _linear_params(ks[5], din, din)
    return dict(wr=wr, br=br, ur=ur, bur=bur,
                wz=wz, bz=bz, uz=uz, buz=buz,
                wg=wg, bg=bgw, ug=ug, bug=bug)


def init_params(key):
    ks = jax.random.split(key, 8)
    din, dff, hd = DIM_INPUT, DIM_FF, N_HEADS * DIM_HEAD
    w_kv, _ = _linear_params(ks[0], din, 2 * hd, bias=False)
    w_q, _ = _linear_params(ks[1], din, hd, bias=False)
    w_pos, _ = _linear_params(ks[2], din, hd, bias=False)
    w_out, _ = _linear_params(ks[3], hd, din, bias=False)
    ff_w1, ff_b1 = _linear_params(ks[4], din, dff)
    ff_w2, ff_b2 = _linear_params(ks[5], dff, din)
    return dict(
        ln1_g=jnp.ones((1, din), jnp.float32), ln1_b=jnp.zeros((1, din), jnp.float32),
        ln2_g=jnp.ones((1, din), jnp.float32), ln2_b=jnp.zeros((1, din), jnp.float32),
        w_kv=w_kv, w_q=w_q, w_pos=w_pos, w_out=w_out,
        ff_w1=ff_w1, ff_b1=ff_b1, ff_w2=ff_w2, ff_b2=ff_b2,
        gate1=_init_gate(ks[6], din), gate2=_init_gate(ks[7], din),
    )


def prepare_kernel_params(raw):
    """Host-side, one-time: pre-concatenate gate weights for the fused kernel."""
    def prep_gate(g):
        return (jnp.concatenate([g['wr'], g['wz'], g['wg']], axis=1),
                jnp.concatenate([g['br'], g['bz'], g['bg']], axis=1),
                jnp.concatenate([g['ur'], g['uz']], axis=1),
                jnp.concatenate([g['bur'], g['buz']], axis=1),
                g['ug'], g['bug'])
    g1_w, g1_bw, g1_u, g1_bu, g1_ug, g1_bug = prep_gate(raw['gate1'])
    g2_w, g2_bw, g2_u, g2_bu, g2_ug, g2_bug = prep_gate(raw['gate2'])
    return dict(
        ln1_g=raw['ln1_g'], ln1_b=raw['ln1_b'],
        ln2_g=raw['ln2_g'], ln2_b=raw['ln2_b'],
        w_q=raw['w_q'], w_kv=raw['w_kv'], w_pos=raw['w_pos'], w_out=raw['w_out'],
        ff_w1=raw['ff_w1'], ff_b1=raw['ff_b1'], ff_w2=raw['ff_w2'], ff_b2=raw['ff_b2'],
        g1_w=g1_w, g1_bw=g1_bw, g1_u=g1_u, g1_bu=g1_bu, g1_ug=g1_ug, g1_bug=g1_bug,
        g2_w=g2_w, g2_bw=g2_bw, g2_u=g2_u, g2_bu=g2_bu, g2_ug=g2_ug, g2_bug=g2_bug)


# ============================ pure-JAX reference ============================
# Mirrors the PyTorch module op-for-op (uses the *raw* un-fused parameters).

def reference_forward(raw, encode_input, pos_emb, u, v, memory):
    T, B, Din = encode_input.shape
    M = memory.shape[0]
    J = T + M
    H, D = N_HEADS, DIM_HEAD
    scale = 1.0 / math.sqrt(D)

    def ln(x, g, b):
        mu = jnp.mean(x, axis=-1, keepdims=True)
        var = jnp.mean((x - mu) ** 2, axis=-1, keepdims=True)
        return (x - mu) / jnp.sqrt(var + EPS) * g + b

    src2 = ln(encode_input, raw['ln1_g'], raw['ln1_b'])
    inp_mem = jnp.concatenate([memory, src2], axis=0)
    kv = jnp.dot(inp_mem, raw['w_kv'])
    head_k, head_v = jnp.split(kv, 2, axis=-1)
    k4 = head_k.reshape(J, B, H, D)
    v4 = head_v.reshape(J, B, H, D)
    q4 = jnp.dot(src2, raw['w_q']).reshape(T, B, H, D)
    pos = jnp.dot(pos_emb, raw['w_pos']).reshape(J, H, D)

    content = jnp.einsum('ibhd,jbhd->ijbh', q4 + u[None, None], k4)
    pos_att = jnp.einsum('ibhd,jhd->ijbh', q4 + v[None, None], pos)
    zp = jnp.zeros((T, 1, B, H), pos_att.dtype)
    pos_att = jnp.concatenate([zp, pos_att], axis=1).reshape(
        J + 1, T, B, H)[1:].reshape(T, J, B, H)
    attn = jax.nn.softmax((content + pos_att) * scale, axis=1)
    av = jnp.einsum('ijbh,jbhd->ibhd', attn, v4).reshape(T, B, H * D)
    attn_out = jnp.dot(av, raw['w_out'])

    def gate_ref(x, y, g):
        r = jax.nn.sigmoid(jnp.dot(y, g['wr']) + g['br'] + jnp.dot(x, g['ur']) + g['bur'])
        z = jax.nn.sigmoid(jnp.dot(y, g['wz']) + g['bz'] + jnp.dot(x, g['uz']) + g['buz'] - BG)
        hh = jnp.tanh(jnp.dot(y, g['wg']) + g['bg'] + jnp.dot(r * x, g['ug']) + g['bug'])
        return (1.0 - z) * x + z * hh

    src = gate_ref(encode_input, attn_out, raw['gate1'])
    src_n = ln(src, raw['ln2_g'], raw['ln2_b'])
    ffh = jnp.maximum(jnp.dot(src_n, raw['ff_w1']) + raw['ff_b1'], 0.0)
    ff = jnp.dot(ffh, raw['ff_w2']) + raw['ff_b2']
    return gate_ref(src, ff, raw['gate2'])


# ================================ main ================================

if __name__ == "__main__":
    key = jax.random.PRNGKey(0)
    kp, kx, kpos, ku, kvv, km = jax.random.split(key, 6)

    raw_params = init_params(kp)
    kparams = prepare_kernel_params(raw_params)

    encode_input = jax.random.normal(kx, (T_SEQ, BATCH, DIM_INPUT), jnp.float32)
    memory = jax.random.normal(km, (M_MEM, BATCH, DIM_INPUT), jnp.float32)
    pos_emb = jax.random.normal(kpos, (T_SEQ + M_MEM, DIM_INPUT), jnp.float32)
    u = jax.random.normal(ku, (N_HEADS, DIM_HEAD), jnp.float32)
    v = jax.random.normal(kvv, (N_HEADS, DIM_HEAD), jnp.float32)

    fwd = jax.jit(stable_transformer_encoder_layer_xl)
    out = fwd(kparams, encode_input, pos_emb, u, v, memory)
    jax.block_until_ready(out)
    assert out.shape == (T_SEQ, BATCH, DIM_INPUT)

    # correctness self-check against a pure-JAX replica of the PyTorch module
    with jax.default_matmul_precision("float32"):
        ref = reference_forward(raw_params, encode_input, pos_emb, u, v, memory)
    assert bool(jnp.allclose(out, ref, atol=2e-2, rtol=2e-2)), \
        float(jnp.max(jnp.abs(out - ref)))

    print("KERNEL_OK")
</pallas_src>

<mosaic_0001>
module attributes {stable_mosaic.version = 11 : i64} {
  func.func @_fused_layer_kernel(%arg0: i32, %arg1: memref<1x8x32xf32, #tpu.memory_space<vmem>>, %arg2: memref<1x4x32xf32, #tpu.memory_space<vmem>>, %arg3: memref<12x32xf32, #tpu.memory_space<vmem>>, %arg4: memref<1x32xf32, #tpu.memory_space<vmem>>, %arg5: memref<1x32xf32, #tpu.memory_space<vmem>>, %arg6: memref<1x32xf32, #tpu.memory_space<vmem>>, %arg7: memref<1x32xf32, #tpu.memory_space<vmem>>, %arg8: memref<32x32xf32, #tpu.memory_space<vmem>>, %arg9: memref<32x64xf32, #tpu.memory_space<vmem>>, %arg10: memref<32x32xf32, #tpu.memory_space<vmem>>, %arg11: memref<32x32xf32, #tpu.memory_space<vmem>>, %arg12: memref<32x96xf32, #tpu.memory_space<vmem>>, %arg13: memref<1x96xf32, #tpu.memory_space<vmem>>, %arg14: memref<32x64xf32, #tpu.memory_space<vmem>>, %arg15: memref<1x64xf32, #tpu.memory_space<vmem>>, %arg16: memref<32x32xf32, #tpu.memory_space<vmem>>, %arg17: memref<1x32xf32, #tpu.memory_space<vmem>>, %arg18: memref<1x32xf32, #tpu.memory_space<vmem>>, %arg19: memref<1x32xf32, #tpu.memory_space<vmem>>, %arg20: memref<32x64xf32, #tpu.memory_space<vmem>>, %arg21: memref<1x64xf32, #tpu.memory_space<vmem>>, %arg22: memref<64x32xf32, #tpu.memory_space<vmem>>, %arg23: memref<1x32xf32, #tpu.memory_space<vmem>>, %arg24: memref<32x96xf32, #tpu.memory_space<vmem>>, %arg25: memref<1x96xf32, #tpu.memory_space<vmem>>, %arg26: memref<32x64xf32, #tpu.memory_space<vmem>>, %arg27: memref<1x64xf32, #tpu.memory_space<vmem>>, %arg28: memref<32x32xf32, #tpu.memory_space<vmem>>, %arg29: memref<1x32xf32, #tpu.memory_space<vmem>>, %arg30: memref<1x8x32xf32, #tpu.memory_space<vmem>>) attributes {dimension_semantics = [#tpu.dimension_semantics<parallel>], iteration_bounds = array<i64: 2>, scalar_prefetch = 0 : i64, scratch_operands = 0 : i64, tpu.core_type = #tpu.core_type<tc>, window_params = [{transform_indices = @transform_0, window_bounds = array<i64: 1, 8, 32>}, {transform_indices = @transform_1, window_bounds = array<i64: 1, 4, 32>}, {pipeline_mode = #tpu.pipeline_mode<synchronous>, transform_indices = @transform_2, window_bounds = array<i64: 12, 32>}, {pipeline_mode = #tpu.pipeline_mode<synchronous>, transform_indices = @transform_3, window_bounds = array<i64: 1, 32>}, {pipeline_mode = #tpu.pipeline_mode<synchronous>, transform_indices = @transform_4, window_bounds = array<i64: 1, 32>}, {pipeline_mode = #tpu.pipeline_mode<synchronous>, transform_indices = @transform_5, window_bounds = array<i64: 1, 32>}, {pipeline_mode = #tpu.pipeline_mode<synchronous>, transform_indices = @transform_6, window_bounds = array<i64: 1, 32>}, {pipeline_mode = #tpu.pipeline_mode<synchronous>, transform_indices = @transform_7, window_bounds = array<i64: 32, 32>}, {pipeline_mode = #tpu.pipeline_mode<synchronous>, transform_indices = @transform_8, window_bounds = array<i64: 32, 64>}, {pipeline_mode = #tpu.pipeline_mode<synchronous>, transform_indices = @transform_9, window_bounds = array<i64: 32, 32>}, {pipeline_mode = #tpu.pipeline_mode<synchronous>, transform_indices = @transform_10, window_bounds = array<i64: 32, 32>}, {pipeline_mode = #tpu.pipeline_mode<synchronous>, transform_indices = @transform_11, window_bounds = array<i64: 32, 96>}, {pipeline_mode = #tpu.pipeline_mode<synchronous>, transform_indices = @transform_12, window_bounds = array<i64: 1, 96>}, {pipeline_mode = #tpu.pipeline_mode<synchronous>, transform_indices = @transform_13, window_bounds = array<i64: 32, 64>}, {pipeline_mode = #tpu.pipeline_mode<synchronous>, transform_indices = @transform_14, window_bounds = array<i64: 1, 64>}, {pipeline_mode = #tpu.pipeline_mode<synchronous>, transform_indices = @transform_15, window_bounds = array<i64: 32, 32>}, {pipeline_mode = #tpu.pipeline_mode<synchronous>, transform_indices = @transform_16, window_bounds = array<i64: 1, 32>}, {pipeline_mode = #tpu.pipeline_mode<synchronous>, transform_indices = @transform_17, window_bounds = array<i64: 1, 32>}, {pipeline_mode = #tpu.pipeline_mode<synchronous>, transform_indices = @transform_18, window_bounds = array<i64: 1, 32>}, {pipeline_mode = #tpu.pipeline_mode<synchronous>, transform_indices = @transform_19, window_bounds = array<i64: 32, 64>}, {pipeline_mode = #tpu.pipeline_mode<synchronous>, transform_indices = @transform_20, window_bounds = array<i64: 1, 64>}, {pipeline_mode = #tpu.pipeline_mode<synchronous>, transform_indices = @transform_21, window_bounds = array<i64: 64, 32>}, {pipeline_mode = #tpu.pipeline_mode<synchronous>, transform_indices = @transform_22, window_bounds = array<i64: 1, 32>}, {pipeline_mode = #tpu.pipeline_mode<synchronous>, transform_indices = @transform_23, window_bounds = array<i64: 32, 96>}, {pipeline_mode = #tpu.pipeline_mode<synchronous>, transform_indices = @transform_24, window_bounds = array<i64: 1, 96>}, {pipeline_mode = #tpu.pipeline_mode<synchronous>, transform_indices = @transform_25, window_bounds = array<i64: 32, 64>}, {pipeline_mode = #tpu.pipeline_mode<synchronous>, transform_indices = @transform_26, window_bounds = array<i64: 1, 64>}, {pipeline_mode = #tpu.pipeline_mode<synchronous>, transform_indices = @transform_27, window_bounds = array<i64: 32, 32>}, {pipeline_mode = #tpu.pipeline_mode<synchronous>, transform_indices = @transform_28, window_bounds = array<i64: 1, 32>}, {transform_indices = @transform_29, window_bounds = array<i64: 1, 8, 32>}]} {
    %c0 = arith.constant 0 : index
    %c0_0 = arith.constant 0 : index
    %c0_1 = arith.constant 0 : index
    %0 = vector.load %arg1[%c0, %c0_0, %c0_1] : memref<1x8x32xf32, #tpu.memory_space<vmem>>, vector<1x8x32xf32>
    %1 = vector.shape_cast %0 : vector<1x8x32xf32> to vector<8x32xf32>
    %c0_2 = arith.constant 0 : index
    %c0_3 = arith.constant 0 : index
    %c0_4 = arith.constant 0 : index
    %2 = vector.load %arg2[%c0_2, %c0_3, %c0_4] : memref<1x4x32xf32, #tpu.memory_space<vmem>>, vector<1x4x32xf32>
    %3 = vector.shape_cast %2 : vector<1x4x32xf32> to vector<4x32xf32>
    %cst = arith.constant dense<0.000000e+00> : vector<8xf32>
    %4 = vector.multi_reduction <add>, %1, %cst [1] : vector<8x32xf32> to vector<8xf32>
    %5 = vector.shape_cast %4 : vector<8xf32> to vector<8x1xf32>
    %cst_5 = arith.constant 3.200000e+01 : f32
    %6 = vector.broadcast %cst_5 : f32 to vector<8x1xf32>
    %7 = arith.divf %5, %6 : vector<8x1xf32>
    %8 = vector.broadcast %7 : vector<8x1xf32> to vector<8x32xf32>
    %9 = arith.subf %1, %8 : vector<8x32xf32>
    %10 = arith.mulf %9, %9 : vector<8x32xf32>
    %cst_6 = arith.constant dense<0.000000e+00> : vector<8xf32>
    %11 = vector.multi_reduction <add>, %10, %cst_6 [1] : vector<8x32xf32> to vector<8xf32>
    %12 = vector.shape_cast %11 : vector<8xf32> to vector<8x1xf32>
    %cst_7 = arith.constant 3.200000e+01 : f32
    %13 = vector.broadcast %cst_7 : f32 to vector<8x1xf32>
    %14 = arith.divf %12, %13 : vector<8x1xf32>
    %15 = vector.broadcast %7 : vector<8x1xf32> to vector<8x32xf32>
    %16 = arith.subf %1, %15 : vector<8x32xf32>
    %cst_8 = arith.constant 9.99999974E-6 : f32
    %17 = vector.broadcast %cst_8 : f32 to vector<8x1xf32>
    %18 = arith.addf %14, %17 : vector<8x1xf32>
    %19 = math.rsqrt %18 : vector<8x1xf32>
    %20 = vector.broadcast %19 : vector<8x1xf32> to vector<8x32xf32>
    %21 = arith.mulf %16, %20 : vector<8x32xf32>
    %c0_9 = arith.constant 0 : index
    %c0_10 = arith.constant 0 : index
    %22 = vector.load %arg6[%c0_9, %c0_10] : memref<1x32xf32, #tpu.memory_space<vmem>>, vector<1x32xf32>
    %23 = vector.broadcast %22 : vector<1x32xf32> to vector<8x32xf32>
    %24 = arith.mulf %21, %23 : vector<8x32xf32>
    %c0_11 = arith.constant 0 : index
    %c0_12 = arith.constant 0 : index
    %25 = vector.load %arg7[%c0_11, %c0_12] : memref<1x32xf32, #tpu.memory_space<vmem>>, vector<1x32xf32>
    %26 = vector.broadcast %25 : vector<1x32xf32> to vector<8x32xf32>
    %27 = arith.addf %24, %26 : vector<8x32xf32>
    %c0_13 = arith.constant 0 : index
    %c0_14 = arith.constant 0 : index
    %28 = vector.load %arg8[%c0_13, %c0_14] : memref<32x32xf32, #tpu.memory_space<vmem>>, vector<32x32xf32>
    %cst_15 = arith.constant dense<0.000000e+00> : vector<8x32xf32>
    %29 = tpu.matmul %27, %28, %cst_15 {dimension_numbers = #tpu.dot_dimension_numbers<[1], [0], [0], [1], [0, 0, 1, 1], [], []>} : vector<8x32xf32>, vector<32x32xf32>, vector<8x32xf32> -> vector<8x32xf32>
    %c0_16 = arith.constant 0 : index
    %c0_17 = arith.constant 0 : index
    %30 = vector.load %arg9[%c0_16, %c0_17] : memref<32x64xf32, #tpu.memory_space<vmem>>, vector<32x64xf32>
    %cst_18 = arith.constant dense<0.000000e+00> : vector<8x64xf32>
    %31 = tpu.matmul %27, %30, %cst_18 {dimension_numbers = #tpu.dot_dimension_numbers<[1], [0], [0], [1], [0, 0, 1, 1], [], []>} : vector<8x32xf32>, vector<32x64xf32>, vector<8x64xf32> -> vector<8x64xf32>
    %c0_19 = arith.constant 0 : index
    %c0_20 = arith.constant 0 : index
    %32 = vector.load %arg9[%c0_19, %c0_20] : memref<32x64xf32, #tpu.memory_space<vmem>>, vector<32x64xf32>
    %cst_21 = arith.constant dense<0.000000e+00> : vector<4x64xf32>
    %33 = tpu.matmul %3, %32, %cst_21 {dimension_numbers = #tpu.dot_dimension_numbers<[1], [0], [0], [1], [0, 0, 1, 1], [], []>} : vector<4x32xf32>, vector<32x64xf32>, vector<4x64xf32> -> vector<4x64xf32>
    %c0_22 = arith.constant 0 : index
    %c0_23 = arith.constant 0 : index
    %34 = vector.load %arg3[%c0_22, %c0_23] : memref<12x32xf32, #tpu.memory_space<vmem>>, vector<12x32xf32>
    %c0_24 = arith.constant 0 : index
    %c0_25 = arith.constant 0 : index
    %35 = vector.load %arg10[%c0_24, %c0_25] : memref<32x32xf32, #tpu.memory_space<vmem>>, vector<32x32xf32>
    %cst_26 = arith.constant dense<0.000000e+00> : vector<12x32xf32>
    %36 = tpu.matmul %34, %35, %cst_26 {dimension_numbers = #tpu.dot_dimension_numbers<[1], [0], [0], [1], [0, 0, 1, 1], [], []>} : vector<12x32xf32>, vector<32x32xf32>, vector<12x32xf32> -> vector<12x32xf32>
    %c0_27 = arith.constant 0 : index
    %c0_28 = arith.constant 0 : index
    %37 = vector.load %arg4[%c0_27, %c0_28] : memref<1x32xf32, #tpu.memory_space<vmem>>, vector<1x32xf32>
    %38 = vector.broadcast %37 : vector<1x32xf32> to vector<8x32xf32>
    %39 = arith.addf %29, %38 : vector<8x32xf32>
    %cst_29 = arith.constant 0.353553385 : f32
    %40 = vector.broadcast %cst_29 : f32 to vector<8x32xf32>
    %41 = arith.mulf %39, %40 : vector<8x32xf32>
    %c0_30 = arith.constant 0 : index
    %c0_31 = arith.constant 0 : index
    %42 = vector.load %arg5[%c0_30, %c0_31] : memref<1x32xf32, #tpu.memory_space<vmem>>, vector<1x32xf32>
    %43 = vector.broadcast %42 : vector<1x32xf32> to vector<8x32xf32>
    %44 = arith.addf %29, %43 : vector<8x32xf32>
    %cst_32 = arith.constant 0.353553385 : f32
    %45 = vector.broadcast %cst_32 : f32 to vector<8x32xf32>
    %46 = arith.mulf %44, %45 : vector<8x32xf32>
    %47 = vector.extract_strided_slice %33 {offsets = [0, 0], sizes = [4, 32], strides = [1, 1]} : vector<4x64xf32> to vector<4x32xf32>
    %48 = vector.extract_strided_slice %31 {offsets = [0, 0], sizes = [8, 32], strides = [1, 1]} : vector<8x64xf32> to vector<8x32xf32>
    %49 = tpu.concatenate %47, %48 in 0 : vector<4x32xf32>, vector<8x32xf32> -> vector<12x32xf32>
    %50 = vector.extract_strided_slice %33 {offsets = [0, 32], sizes = [4, 32], strides = [1, 1]} : vector<4x64xf32> to vector<4x32xf32>
    %51 = vector.extract_strided_slice %31 {offsets = [0, 32], sizes = [8, 32], strides = [1, 1]} : vector<8x64xf32> to vector<8x32xf32>
    %52 = tpu.concatenate %50, %51 in 0 : vector<4x32xf32>, vector<8x32xf32> -> vector<12x32xf32>
    %53 = vector.extract_strided_slice %41 {offsets = [0, 0], sizes = [8, 8], strides = [1, 1]} : vector<8x32xf32> to vector<8x8xf32>
    %54 = vector.extract_strided_slice %49 {offsets = [0, 0], sizes = [12, 8], strides = [1, 1]} : vector<12x32xf32> to vector<12x8xf32>
    %cst_33 = arith.constant dense<0.000000e+00> : vector<8x12xf32>
    %55 = tpu.matmul %53, %54, %cst_33 {dimension_numbers = #tpu.dot_dimension_numbers<[1], [1], [0], [0], [0, 0, 1, 0], [], []>} : vector<8x8xf32>, vector<12x8xf32>, vector<8x12xf32> -> vector<8x12xf32>
    %56 = vector.extract_strided_slice %46 {offsets = [0, 0], sizes = [8, 8], strides = [1, 1]} : vector<8x32xf32> to vector<8x8xf32>
    %57 = vector.extract_strided_slice %36 {offsets = [0, 0], sizes = [12, 8], strides = [1, 1]} : vector<12x32xf32> to vector<12x8xf32>
    %cst_34 = arith.constant dense<0.000000e+00> : vector<8x12xf32>
    %58 = tpu.matmul %56, %57, %cst_34 {dimension_numbers = #tpu.dot_dimension_numbers<[1], [1], [0], [0], [0, 0, 1, 0], [], []>} : vector<8x8xf32>, vector<12x8xf32>, vector<8x12xf32> -> vector<8x12xf32>
    %59 = vector.extract_strided_slice %41 {offsets = [0, 8], sizes = [8, 8], strides = [1, 1]} : vector<8x32xf32> to vector<8x8xf32>
    %60 = vector.extract_strided_slice %49 {offsets = [0, 8], sizes = [12, 8], strides = [1, 1]} : vector<12x32xf32> to vector<12x8xf32>
    %cst_35 = arith.constant dense<0.000000e+00> : vector<8x12xf32>
    %61 = tpu.matmul %59, %60, %cst_35 {dimension_numbers = #tpu.dot_dimension_numbers<[1], [1], [0], [0], [0, 0, 1, 0], [], []>} : vector<8x8xf32>, vector<12x8xf32>, vector<8x12xf32> -> vector<8x12xf32>
    %62 = vector.extract_strided_slice %46 {offsets = [0, 8], sizes = [8, 8], strides = [1, 1]} : vector<8x32xf32> to vector<8x8xf32>
    %63 = vector.extract_strided_slice %36 {offsets = [0, 8], sizes = [12, 8], strides = [1, 1]} : vector<12x32xf32> to vector<12x8xf32>
    %cst_36 = arith.constant dense<0.000000e+00> : vector<8x12xf32>
    %64 = tpu.matmul %62, %63, %cst_36 {dimension_numbers = #tpu.dot_dimension_numbers<[1], [1], [0], [0], [0, 0, 1, 0], [], []>} : vector<8x8xf32>, vector<12x8xf32>, vector<8x12xf32> -> vector<8x12xf32>
    %65 = vector.extract_strided_slice %41 {offsets = [0, 16], sizes = [8, 8], strides = [1, 1]} : vector<8x32xf32> to vector<8x8xf32>
    %66 = vector.extract_strided_slice %49 {offsets = [0, 16], sizes = [12, 8], strides = [1, 1]} : vector<12x32xf32> to vector<12x8xf32>
    %cst_37 = arith.constant dense<0.000000e+00> : vector<8x12xf32>
    %67 = tpu.matmul %65, %66, %cst_37 {dimension_numbers = #tpu.dot_dimension_numbers<[1], [1], [0], [0], [0, 0, 1, 0], [], []>} : vector<8x8xf32>, vector<12x8xf32>, vector<8x12xf32> -> vector<8x12xf32>
    %68 = vector.extract_strided_slice %46 {offsets = [0, 16], sizes = [8, 8], strides = [1, 1]} : vector<8x32xf32> to vector<8x8xf32>
    %69 = vector.extract_strided_slice %36 {offsets = [0, 16], sizes = [12, 8], strides = [1, 1]} : vector<12x32xf32> to vector<12x8xf32>
    %cst_38 = arith.constant dense<0.000000e+00> : vector<8x12xf32>
    %70 = tpu.matmul %68, %69, %cst_38 {dimension_numbers = #tpu.dot_dimension_numbers<[1], [1], [0], [0], [0, 0, 1, 0], [], []>} : vector<8x8xf32>, vector<12x8xf32>, vector<8x12xf32> -> vector<8x12xf32>
    %71 = vector.extract_strided_slice %41 {offsets = [0, 24], sizes = [8, 8], strides = [1, 1]} : vector<8x32xf32> to vector<8x8xf32>
    %72 = vector.extract_strided_slice %49 {offsets = [0, 24], sizes = [12, 8], strides = [1, 1]} : vector<12x32xf32> to vector<12x8xf32>
    %cst_39 = arith.constant dense<0.000000e+00> : vector<8x12xf32>
    %73 = tpu.matmul %71, %72, %cst_39 {dimension_numbers = #tpu.dot_dimension_numbers<[1], [1], [0], [0], [0, 0, 1, 0], [], []>} : vector<8x8xf32>, vector<12x8xf32>, vector<8x12xf32> -> vector<8x12xf32>
    %74 = vector.extract_strided_slice %46 {offsets = [0, 24], sizes = [8, 8], strides = [1, 1]} : vector<8x32xf32> to vector<8x8xf32>
    %75 = vector.extract_strided_slice %36 {offsets = [0, 24], sizes = [12, 8], strides = [1, 1]} : vector<12x32xf32> to vector<12x8xf32>
    %cst_40 = arith.constant dense<0.000000e+00> : vector<8x12xf32>
    %76 = tpu.matmul %74, %75, %cst_40 {dimension_numbers = #tpu.dot_dimension_numbers<[1], [1], [0], [0], [0, 0, 1, 0], [], []>} : vector<8x8xf32>, vector<12x8xf32>, vector<8x12xf32> -> vector<8x12xf32>
    %77 = tpu.concatenate %55, %61, %67, %73 in 0 : vector<8x12xf32>, vector<8x12xf32>, vector<8x12xf32>, vector<8x12xf32> -> vector<32x12xf32>
    %78 = tpu.concatenate %58, %64, %70, %76 in 0 : vector<8x12xf32>, vector<8x12xf32>, vector<8x12xf32>, vector<8x12xf32> -> vector<32x12xf32>
    %79 = vector.extract_strided_slice %78 {offsets = [1, 0], sizes = [31, 12], strides = [1, 1]} : vector<32x12xf32> to vector<31x12xf32>
    %80 = vector.extract_strided_slice %78 {offsets = [0, 0], sizes = [1, 12], strides = [1, 1]} : vector<32x12xf32> to vector<1x12xf32>
    %81 = tpu.concatenate %79, %80 in 0 : vector<31x12xf32>, vector<1x12xf32> -> vector<32x12xf32>
    %cst_41 = arith.constant 0.000000e+00 : f32
    %82 = vector.broadcast %cst_41 : f32 to vector<32x1xf32>
    %83 = tpu.concatenate %78, %82, %81 in 1 : vector<32x12xf32>, vector<32x1xf32>, vector<32x12xf32> -> vector<32x25xf32>
    %84 = tpu.iota {dimensions = array<i32: 0>} : vector<32x12xi32>
    %c8_i32 = arith.constant 8 : i32
    %c0_i32 = arith.constant 0 : i32
    %85 = arith.cmpi eq, %c8_i32, %c0_i32 : i32
    %c1_i32 = arith.constant 1 : i32
    %86 = arith.select %85, %c1_i32, %c8_i32 : i32
    %87 = vector.broadcast %86 : i32 to vector<32x12xi32>
    %88 = arith.remsi %84, %87 : vector<32x12xi32>
    %c0_i32_42 = arith.constant 0 : i32
    %89 = vector.broadcast %c0_i32_42 : i32 to vector<32x12xi32>
    %90 = arith.cmpi ne, %88, %89 : vector<32x12xi32>
    %c0_i32_43 = arith.constant 0 : i32
    %91 = vector.broadcast %c0_i32_43 : i32 to vector<32x12xi32>
    %92 = arith.cmpi slt, %88, %91 : vector<32x12xi32>
    %c0_i32_44 = arith.constant 0 : i32
    %93 = arith.cmpi slt, %86, %c0_i32_44 : i32
    %94 = vector.broadcast %93 : i1 to vector<32x12xi1>
    %95 = vector.broadcast %94 : vector<32x12xi1> to vector<32x12xi1>
    %96 = arith.xori %92, %95 : vector<32x12xi1>
    %97 = arith.andi %96, %90 : vector<32x12xi1>
    %98 = vector.broadcast %86 : i32 to vector<32x12xi32>
    %99 = arith.addi %88, %98 : vector<32x12xi32>
    %100 = arith.select %97, %99, %88 : vector<32x12xi1>, vector<32x12xi32>
    %cst_45 = arith.constant 0.000000e+00 : f32
    %101 = vector.broadcast %cst_45 : f32 to vector<32x12xf32>
    %c0_i32_46 = arith.constant 0 : i32
    %102 = vector.broadcast %c0_i32_46 : i32 to vector<32x12xi32>
    %103 = arith.cmpi eq, %100, %102 : vector<32x12xi32>
    %104 = vector.extract_strided_slice %83 {offsets = [0, 7], sizes = [32, 12], strides = [1, 1]} : vector<32x25xf32> to vector<32x12xf32>
    %105 = arith.select %103, %104, %101 : vector<32x12xi1>, vector<32x12xf32>
    %c1_i32_47 = arith.constant 1 : i32
    %106 = vector.broadcast %c1_i32_47 : i32 to vector<32x12xi32>
    %107 = arith.cmpi eq, %100, %106 : vector<32x12xi32>
    %108 = vector.extract_strided_slice %83 {offsets = [0, 6], sizes = [32, 12], strides = [1, 1]} : vector<32x25xf32> to vector<32x12xf32>
    %109 = arith.select %107, %108, %105 : vector<32x12xi1>, vector<32x12xf32>
    %c2_i32 = arith.constant 2 : i32
    %110 = vector.broadcast %c2_i32 : i32 to vector<32x12xi32>
    %111 = arith.cmpi eq, %100, %110 : vector<32x12xi32>
    %112 = vector.extract_strided_slice %83 {offsets = [0, 5], sizes = [32, 12], strides = [1, 1]} : vector<32x25xf32> to vector<32x12xf32>
    %113 = arith.select %111, %112, %109 : vector<32x12xi1>, vector<32x12xf32>
    %c3_i32 = arith.constant 3 : i32
    %114 = vector.broadcast %c3_i32 : i32 to vector<32x12xi32>
    %115 = arith.cmpi eq, %100, %114 : vector<32x12xi32>
    %116 = vector.extract_strided_slice %83 {offsets = [0, 4], sizes = [32, 12], strides = [1, 1]} : vector<32x25xf32> to vector<32x12xf32>
    %117 = arith.select %115, %116, %113 : vector<32x12xi1>, vector<32x12xf32>
    %c4_i32 = arith.constant 4 : i32
    %118 = vector.broadcast %c4_i32 : i32 to vector<32x12xi32>
    %119 = arith.cmpi eq, %100, %118 : vector<32x12xi32>
    %120 = vector.extract_strided_slice %83 {offsets = [0, 3], sizes = [32, 12], strides = [1, 1]} : vector<32x25xf32> to vector<32x12xf32>
    %121 = arith.select %119, %120, %117 : vector<32x12xi1>, vector<32x12xf32>
    %c5_i32 = arith.constant 5 : i32
    %122 = vector.broadcast %c5_i32 : i32 to vector<32x12xi32>
    %123 = arith.cmpi eq, %100, %122 : vector<32x12xi32>
    %124 = vector.extract_strided_slice %83 {offsets = [0, 2], sizes = [32, 12], strides = [1, 1]} : vector<32x25xf32> to vector<32x12xf32>
    %125 = arith.select %123, %124, %121 : vector<32x12xi1>, vector<32x12xf32>
    %c6_i32 = arith.constant 6 : i32
    %126 = vector.broadcast %c6_i32 : i32 to vector<32x12xi32>
    %127 = arith.cmpi eq, %100, %126 : vector<32x12xi32>
    %128 = vector.extract_strided_slice %83 {offsets = [0, 1], sizes = [32, 12], strides = [1, 1]} : vector<32x25xf32> to vector<32x12xf32>
    %129 = arith.select %127, %128, %125 : vector<32x12xi1>, vector<32x12xf32>
    %c7_i32 = arith.constant 7 : i32
    %130 = vector.broadcast %c7_i32 : i32 to vector<32x12xi32>
    %131 = arith.cmpi eq, %100, %130 : vector<32x12xi32>
    %132 = vector.extract_strided_slice %83 {offsets = [0, 0], sizes = [32, 12], strides = [1, 1]} : vector<32x25xf32> to vector<32x12xf32>
    %133 = arith.select %131, %132, %129 : vector<32x12xi1>, vector<32x12xf32>
    %134 = arith.addf %77, %133 : vector<32x12xf32>
    %cst_48 = arith.constant dense<0xFF800000> : vector<32xf32>
    %135 = vector.multi_reduction <maximumf>, %134, %cst_48 [1] : vector<32x12xf32> to vector<32xf32>
    %136 = vector.shape_cast %135 : vector<32xf32> to vector<32x1xf32>
    %137 = vector.broadcast %136 : vector<32x1xf32> to vector<32x12xf32>
    %138 = arith.subf %134, %137 : vector<32x12xf32>
    %139 = math.exp %138 : vector<32x12xf32>
    %cst_49 = arith.constant dense<0.000000e+00> : vector<32xf32>
    %140 = vector.multi_reduction <add>, %139, %cst_49 [1] : vector<32x12xf32> to vector<32xf32>
    %141 = vector.shape_cast %140 : vector<32xf32> to vector<32x1xf32>
    %142 = tpu.reciprocal %141 {approx = true} : vector<32x1xf32> -> vector<32x1xf32>
    %143 = vector.broadcast %142 : vector<32x1xf32> to vector<32x12xf32>
    %144 = arith.mulf %139, %143 : vector<32x12xf32>
    %145 = vector.extract_strided_slice %144 {offsets = [0, 0], sizes = [8, 12], strides = [1, 1]} : vector<32x12xf32> to vector<8x12xf32>
    %146 = vector.extract_strided_slice %52 {offsets = [0, 0], sizes = [12, 8], strides = [1, 1]} : vector<12x32xf32> to vector<12x8xf32>
    %cst_50 = arith.constant dense<0.000000e+00> : vector<8x8xf32>
    %147 = tpu.matmul %145, %146, %cst_50 {dimension_numbers = #tpu.dot_dimension_numbers<[1], [0], [0], [1], [0, 0, 1, 1], [], []>} : vector<8x12xf32>, vector<12x8xf32>, vector<8x8xf32> -> vector<8x8xf32>
    %148 = vector.extract_strided_slice %144 {offsets = [8, 0], sizes = [8, 12], strides = [1, 1]} : vector<32x12xf32> to vector<8x12xf32>
    %149 = vector.extract_strided_slice %52 {offsets = [0, 8], sizes = [12, 8], strides = [1, 1]} : vector<12x32xf32> to vector<12x8xf32>
    %cst_51 = arith.constant dense<0.000000e+00> : vector<8x8xf32>
    %150 = tpu.matmul %148, %149, %cst_51 {dimension_numbers = #tpu.dot_dimension_numbers<[1], [0], [0], [1], [0, 0, 1, 1], [], []>} : vector<8x12xf32>, vector<12x8xf32>, vector<8x8xf32> -> vector<8x8xf32>
    %151 = vector.extract_strided_slice %144 {offsets = [16, 0], sizes = [8, 12], strides = [1, 1]} : vector<32x12xf32> to vector<8x12xf32>
    %152 = vector.extract_strided_slice %52 {offsets = [0, 16], sizes = [12, 8], strides = [1, 1]} : vector<12x32xf32> to vector<12x8xf32>
    %cst_52 = arith.constant dense<0.000000e+00> : vector<8x8xf32>
    %153 = tpu.matmul %151, %152, %cst_52 {dimension_numbers = #tpu.dot_dimension_numbers<[1], [0], [0], [1], [0, 0, 1, 1], [], []>} : vector<8x12xf32>, vector<12x8xf32>, vector<8x8xf32> -> vector<8x8xf32>
    %154 = vector.extract_strided_slice %144 {offsets = [24, 0], sizes = [8, 12], strides = [1, 1]} : vector<32x12xf32> to vector<8x12xf32>
    %155 = vector.extract_strided_slice %52 {offsets = [0, 24], sizes = [12, 8], strides = [1, 1]} : vector<12x32xf32> to vector<12x8xf32>
    %cst_53 = arith.constant dense<0.000000e+00> : vector<8x8xf32>
    %156 = tpu.matmul %154, %155, %cst_53 {dimension_numbers = #tpu.dot_dimension_numbers<[1], [0], [0], [1], [0, 0, 1, 1], [], []>} : vector<8x12xf32>, vector<12x8xf32>, vector<8x8xf32> -> vector<8x8xf32>
    %157 = tpu.concatenate %147, %150, %153, %156 in 1 : vector<8x8xf32>, vector<8x8xf32>, vector<8x8xf32>, vector<8x8xf32> -> vector<8x32xf32>
    %c0_54 = arith.constant 0 : index
    %c0_55 = arith.constant 0 : index
    %158 = vector.load %arg11[%c0_54, %c0_55] : memref<32x32xf32, #tpu.memory_space<vmem>>, vector<32x32xf32>
    %cst_56 = arith.constant dense<0.000000e+00> : vector<8x32xf32>
    %159 = tpu.matmul %157, %158, %cst_56 {dimension_numbers = #tpu.dot_dimension_numbers<[1], [0], [0], [1], [0, 0, 1, 1], [], []>} : vector<8x32xf32>, vector<32x32xf32>, vector<8x32xf32> -> vector<8x32xf32>
    %c0_57 = arith.constant 0 : index
    %c0_58 = arith.constant 0 : index
    %160 = vector.load %arg12[%c0_57, %c0_58] : memref<32x96xf32, #tpu.memory_space<vmem>>, vector<32x96xf32>
    %cst_59 = arith.constant dense<0.000000e+00> : vector<8x96xf32>
    %161 = tpu.matmul %159, %160, %cst_59 {dimension_numbers = #tpu.dot_dimension_numbers<[1], [0], [0], [1], [0, 0, 1, 1], [], []>} : vector<8x32xf32>, vector<32x96xf32>, vector<8x96xf32> -> vector<8x96xf32>
    %c0_60 = arith.constant 0 : index
    %c0_61 = arith.constant 0 : index
    %162 = vector.load %arg13[%c0_60, %c0_61] : memref<1x96xf32, #tpu.memory_space<vmem>>, vector<1x96xf32>
    %163 = vector.broadcast %162 : vector<1x96xf32> to vector<8x96xf32>
    %164 = arith.addf %161, %163 : vector<8x96xf32>
    %c0_62 = arith.constant 0 : index
    %c0_63 = arith.constant 0 : index
    %165 = vector.load %arg14[%c0_62, %c0_63] : memref<32x64xf32, #tpu.memory_space<vmem>>, vector<32x64xf32>
    %cst_64 = arith.constant dense<0.000000e+00> : vector<8x64xf32>
    %166 = tpu.matmul %1, %165, %cst_64 {dimension_numbers = #tpu.dot_dimension_numbers<[1], [0], [0], [1], [0, 0, 1, 1], [], []>} : vector<8x32xf32>, vector<32x64xf32>, vector<8x64xf32> -> vector<8x64xf32>
    %c0_65 = arith.constant 0 : index
    %c0_66 = arith.constant 0 : index
    %167 = vector.load %arg15[%c0_65, %c0_66] : memref<1x64xf32, #tpu.memory_space<vmem>>, vector<1x64xf32>
    %168 = vector.broadcast %167 : vector<1x64xf32> to vector<8x64xf32>
    %169 = arith.addf %166, %168 : vector<8x64xf32>
    %170 = vector.extract_strided_slice %164 {offsets = [0, 0], sizes = [8, 32], strides = [1, 1]} : vector<8x96xf32> to vector<8x32xf32>
    %171 = vector.extract_strided_slice %169 {offsets = [0, 0], sizes = [8, 32], strides = [1, 1]} : vector<8x64xf32> to vector<8x32xf32>
    %172 = arith.addf %170, %171 : vector<8x32xf32>
    %173 = arith.negf %172 : vector<8x32xf32>
    %174 = math.exp %173 : vector<8x32xf32>
    %cst_67 = arith.constant 1.000000e+00 : f32
    %175 = vector.broadcast %cst_67 : f32 to vector<8x32xf32>
    %176 = arith.addf %175, %174 : vector<8x32xf32>
    %177 = arith.divf %175, %176 : vector<8x32xf32>
    %178 = vector.extract_strided_slice %164 {offsets = [0, 32], sizes = [8, 32], strides = [1, 1]} : vector<8x96xf32> to vector<8x32xf32>
    %179 = vector.extract_strided_slice %169 {offsets = [0, 32], sizes = [8, 32], strides = [1, 1]} : vector<8x64xf32> to vector<8x32xf32>
    %180 = arith.addf %178, %179 : vector<8x32xf32>
    %cst_68 = arith.constant 1.000000e-01 : f32
    %181 = vector.broadcast %cst_68 : f32 to vector<8x32xf32>
    %182 = arith.subf %180, %181 : vector<8x32xf32>
    %183 = arith.negf %182 : vector<8x32xf32>
    %184 = math.exp %183 : vector<8x32xf32>
    %cst_69 = arith.constant 1.000000e+00 : f32
    %185 = vector.broadcast %cst_69 : f32 to vector<8x32xf32>
    %186 = arith.addf %185, %184 : vector<8x32xf32>
    %187 = arith.divf %185, %186 : vector<8x32xf32>
    %188 = vector.extract_strided_slice %164 {offsets = [0, 64], sizes = [8, 32], strides = [1, 1]} : vector<8x96xf32> to vector<8x32xf32>
    %189 = arith.mulf %177, %1 : vector<8x32xf32>
    %c0_70 = arith.constant 0 : index
    %c0_71 = arith.constant 0 : index
    %190 = vector.load %arg16[%c0_70, %c0_71] : memref<32x32xf32, #tpu.memory_space<vmem>>, vector<32x32xf32>
    %cst_72 = arith.constant dense<0.000000e+00> : vector<8x32xf32>
    %191 = tpu.matmul %189, %190, %cst_72 {dimension_numbers = #tpu.dot_dimension_numbers<[1], [0], [0], [1], [0, 0, 1, 1], [], []>} : vector<8x32xf32>, vector<32x32xf32>, vector<8x32xf32> -> vector<8x32xf32>
    %192 = arith.addf %188, %191 : vector<8x32xf32>
    %c0_73 = arith.constant 0 : index
    %c0_74 = arith.constant 0 : index
    %193 = vector.load %arg17[%c0_73, %c0_74] : memref<1x32xf32, #tpu.memory_space<vmem>>, vector<1x32xf32>
    %194 = vector.broadcast %193 : vector<1x32xf32> to vector<8x32xf32>
    %195 = arith.addf %192, %194 : vector<8x32xf32>
    %196 = math.tanh %195 : vector<8x32xf32>
    %cst_75 = arith.constant 1.000000e+00 : f32
    %197 = vector.broadcast %cst_75 : f32 to vector<8x32xf32>
    %198 = arith.subf %197, %187 : vector<8x32xf32>
    %199 = arith.mulf %198, %1 : vector<8x32xf32>
    %200 = arith.mulf %187, %196 : vector<8x32xf32>
    %201 = arith.addf %199, %200 : vector<8x32xf32>
    %cst_76 = arith.constant dense<0.000000e+00> : vector<8xf32>
    %202 = vector.multi_reduction <add>, %201, %cst_76 [1] : vector<8x32xf32> to vector<8xf32>
    %203 = vector.shape_cast %202 : vector<8xf32> to vector<8x1xf32>
    %cst_77 = arith.constant 3.200000e+01 : f32
    %204 = vector.broadcast %cst_77 : f32 to vector<8x1xf32>
    %205 = arith.divf %203, %204 : vector<8x1xf32>
    %206 = vector.broadcast %205 : vector<8x1xf32> to vector<8x32xf32>
    %207 = arith.subf %201, %206 : vector<8x32xf32>
    %208 = arith.mulf %207, %207 : vector<8x32xf32>
    %cst_78 = arith.constant dense<0.000000e+00> : vector<8xf32>
    %209 = vector.multi_reduction <add>, %208, %cst_78 [1] : vector<8x32xf32> to vector<8xf32>
    %210 = vector.shape_cast %209 : vector<8xf32> to vector<8x1xf32>
    %cst_79 = arith.constant 3.200000e+01 : f32
    %211 = vector.broadcast %cst_79 : f32 to vector<8x1xf32>
    %212 = arith.divf %210, %211 : vector<8x1xf32>
    %213 = vector.broadcast %205 : vector<8x1xf32> to vector<8x32xf32>
    %214 = arith.subf %201, %213 : vector<8x32xf32>
    %cst_80 = arith.constant 9.99999974E-6 : f32
    %215 = vector.broadcast %cst_80 : f32 to vector<8x1xf32>
    %216 = arith.addf %212, %215 : vector<8x1xf32>
    %217 = math.rsqrt %216 : vector<8x1xf32>
    %218 = vector.broadcast %217 : vector<8x1xf32> to vector<8x32xf32>
    %219 = arith.mulf %214, %218 : vector<8x32xf32>
    %c0_81 = arith.constant 0 : index
    %c0_82 = arith.constant 0 : index
    %220 = vector.load %arg18[%c0_81, %c0_82] : memref<1x32xf32, #tpu.memory_space<vmem>>, vector<1x32xf32>
    %221 = vector.broadcast %220 : vector<1x32xf32> to vector<8x32xf32>
    %222 = arith.mulf %219, %221 : vector<8x32xf32>
    %c0_83 = arith.constant 0 : index
    %c0_84 = arith.constant 0 : index
    %223 = vector.load %arg19[%c0_83, %c0_84] : memref<1x32xf32, #tpu.memory_space<vmem>>, vector<1x32xf32>
    %224 = vector.broadcast %223 : vector<1x32xf32> to vector<8x32xf32>
    %225 = arith.addf %222, %224 : vector<8x32xf32>
    %c0_85 = arith.constant 0 : index
    %c0_86 = arith.constant 0 : index
    %226 = vector.load %arg20[%c0_85, %c0_86] : memref<32x64xf32, #tpu.memory_space<vmem>>, vector<32x64xf32>
    %cst_87 = arith.constant dense<0.000000e+00> : vector<8x64xf32>
    %227 = tpu.matmul %225, %226, %cst_87 {dimension_numbers = #tpu.dot_dimension_numbers<[1], [0], [0], [1], [0, 0, 1, 1], [], []>} : vector<8x32xf32>, vector<32x64xf32>, vector<8x64xf32> -> vector<8x64xf32>
    %c0_88 = arith.constant 0 : index
    %c0_89 = arith.constant 0 : index
    %228 = vector.load %arg21[%c0_88, %c0_89] : memref<1x64xf32, #tpu.memory_space<vmem>>, vector<1x64xf32>
    %229 = vector.broadcast %228 : vector<1x64xf32> to vector<8x64xf32>
    %230 = arith.addf %227, %229 : vector<8x64xf32>
    %cst_90 = arith.constant 0.000000e+00 : f32
    %231 = vector.broadcast %cst_90 : f32 to vector<8x64xf32>
    %232 = arith.maximumf %230, %231 : vector<8x64xf32>
    %c0_91 = arith.constant 0 : index
    %c0_92 = arith.constant 0 : index
    %233 = vector.load %arg22[%c0_91, %c0_92] : memref<64x32xf32, #tpu.memory_space<vmem>>, vector<64x32xf32>
    %cst_93 = arith.constant dense<0.000000e+00> : vector<8x32xf32>
    %234 = tpu.matmul %232, %233, %cst_93 {dimension_numbers = #tpu.dot_dimension_numbers<[1], [0], [0], [1], [0, 0, 1, 1], [], []>} : vector<8x64xf32>, vector<64x32xf32>, vector<8x32xf32> -> vector<8x32xf32>
    %c0_94 = arith.constant 0 : index
    %c0_95 = arith.constant 0 : index
    %235 = vector.load %arg23[%c0_94, %c0_95] : memref<1x32xf32, #tpu.memory_space<vmem>>, vector<1x32xf32>
    %236 = vector.broadcast %235 : vector<1x32xf32> to vector<8x32xf32>
    %237 = arith.addf %234, %236 : vector<8x32xf32>
    %c0_96 = arith.constant 0 : index
    %c0_97 = arith.constant 0 : index
    %238 = vector.load %arg24[%c0_96, %c0_97] : memref<32x96xf32, #tpu.memory_space<vmem>>, vector<32x96xf32>
    %cst_98 = arith.constant dense<0.000000e+00> : vector<8x96xf32>
    %239 = tpu.matmul %237, %238, %cst_98 {dimension_numbers = #tpu.dot_dimension_numbers<[1], [0], [0], [1], [0, 0, 1, 1], [], []>} : vector<8x32xf32>, vector<32x96xf32>, vector<8x96xf32> -> vector<8x96xf32>
    %c0_99 = arith.constant 0 : index
    %c0_100 = arith.constant 0 : index
    %240 = vector.load %arg25[%c0_99, %c0_100] : memref<1x96xf32, #tpu.memory_space<vmem>>, vector<1x96xf32>
    %241 = vector.broadcast %240 : vector<1x96xf32> to vector<8x96xf32>
    %242 = arith.addf %239, %241 : vector<8x96xf32>
    %c0_101 = arith.constant 0 : index
    %c0_102 = arith.constant 0 : index
    %243 = vector.load %arg26[%c0_101, %c0_102] : memref<32x64xf32, #tpu.memory_space<vmem>>, vector<32x64xf32>
    %cst_103 = arith.constant dense<0.000000e+00> : vector<8x64xf32>
    %244 = tpu.matmul %201, %243, %cst_103 {dimension_numbers = #tpu.dot_dimension_numbers<[1], [0], [0], [1], [0, 0, 1, 1], [], []>} : vector<8x32xf32>, vector<32x64xf32>, vector<8x64xf32> -> vector<8x64xf32>
    %c0_104 = arith.constant 0 : index
    %c0_105 = arith.constant 0 : index
    %245 = vector.load %arg27[%c0_104, %c0_105] : memref<1x64xf32, #tpu.memory_space<vmem>>, vector<1x64xf32>
    %246 = vector.broadcast %245 : vector<1x64xf32> to vector<8x64xf32>
    %247 = arith.addf %244, %246 : vector<8x64xf32>
    %248 = vector.extract_strided_slice %242 {offsets = [0, 0], sizes = [8, 32], strides = [1, 1]} : vector<8x96xf32> to vector<8x32xf32>
    %249 = vector.extract_strided_slice %247 {offsets = [0, 0], sizes = [8, 32], strides = [1, 1]} : vector<8x64xf32> to vector<8x32xf32>
    %250 = arith.addf %248, %249 : vector<8x32xf32>
    %251 = arith.negf %250 : vector<8x32xf32>
    %252 = math.exp %251 : vector<8x32xf32>
    %cst_106 = arith.constant 1.000000e+00 : f32
    %253 = vector.broadcast %cst_106 : f32 to vector<8x32xf32>
    %254 = arith.addf %253, %252 : vector<8x32xf32>
    %255 = arith.divf %253, %254 : vector<8x32xf32>
    %256 = vector.extract_strided_slice %242 {offsets = [0, 32], sizes = [8, 32], strides = [1, 1]} : vector<8x96xf32> to vector<8x32xf32>
    %257 = vector.extract_strided_slice %247 {offsets = [0, 32], sizes = [8, 32], strides = [1, 1]} : vector<8x64xf32> to vector<8x32xf32>
    %258 = arith.addf %256, %257 : vector<8x32xf32>
    %cst_107 = arith.constant 1.000000e-01 : f32
    %259 = vector.broadcast %cst_107 : f32 to vector<8x32xf32>
    %260 = arith.subf %258, %259 : vector<8x32xf32>
    %261 = arith.negf %260 : vector<8x32xf32>
    %262 = math.exp %261 : vector<8x32xf32>
    %cst_108 = arith.constant 1.000000e+00 : f32
    %263 = vector.broadcast %cst_108 : f32 to vector<8x32xf32>
    %264 = arith.addf %263, %262 : vector<8x32xf32>
    %265 = arith.divf %263, %264 : vector<8x32xf32>
    %266 = vector.extract_strided_slice %242 {offsets = [0, 64], sizes = [8, 32], strides = [1, 1]} : vector<8x96xf32> to vector<8x32xf32>
    %267 = arith.mulf %255, %201 : vector<8x32xf32>
    %c0_109 = arith.constant 0 : index
    %c0_110 = arith.constant 0 : index
    %268 = vector.load %arg28[%c0_109, %c0_110] : memref<32x32xf32, #tpu.memory_space<vmem>>, vector<32x32xf32>
    %cst_111 = arith.constant dense<0.000000e+00> : vector<8x32xf32>
    %269 = tpu.matmul %267, %268, %cst_111 {dimension_numbers = #tpu.dot_dimension_numbers<[1], [0], [0], [1], [0, 0, 1, 1], [], []>} : vector<8x32xf32>, vector<32x32xf32>, vector<8x32xf32> -> vector<8x32xf32>
    %270 = arith.addf %266, %269 : vector<8x32xf32>
    %c0_112 = arith.constant 0 : index
    %c0_113 = arith.constant 0 : index
    %271 = vector.load %arg29[%c0_112, %c0_113] : memref<1x32xf32, #tpu.memory_space<vmem>>, vector<1x32xf32>
    %272 = vector.broadcast %271 : vector<1x32xf32> to vector<8x32xf32>
    %273 = arith.addf %270, %272 : vector<8x32xf32>
    %274 = math.tanh %273 : vector<8x32xf32>
    %cst_114 = arith.constant 1.000000e+00 : f32
    %275 = vector.broadcast %cst_114 : f32 to vector<8x32xf32>
    %276 = arith.subf %275, %265 : vector<8x32xf32>
    %277 = arith.mulf %276, %201 : vector<8x32xf32>
    %278 = arith.mulf %265, %274 : vector<8x32xf32>
    %279 = arith.addf %277, %278 : vector<8x32xf32>
    %c0_115 = arith.constant 0 : index
    %c0_116 = arith.constant 0 : index
    %c0_117 = arith.constant 0 : index
    %280 = vector.load %arg30[%c0_115, %c0_116, %c0_117] : memref<1x8x32xf32, #tpu.memory_space<vmem>>, vector<1x8x32xf32>
    %281 = vector.shape_cast %280 : vector<1x8x32xf32> to vector<8x32xf32>
    %282 = vector.shape_cast %279 : vector<8x32xf32> to vector<1x8x32xf32>
    tpu.vector_store %arg30[%c0_115, %c0_116, %c0_117], %282 {strides = array<i32>} : memref<1x8x32xf32, #tpu.memory_space<vmem>>, vector<1x8x32xf32>,
    return
  }
  func.func @transform_0(%arg0: i32) -> (i32, i32, i32) {
    %c0_i32 = arith.constant 0 : i32
    %c0_i32_0 = arith.constant 0 : i32
    %c0_i32_1 = arith.constant 0 : i32
    return %arg0, %c0_i32, %c0_i32_0 : i32, i32, i32
  }
  func.func @transform_1(%arg0: i32) -> (i32, i32, i32) {
    %c0_i32 = arith.constant 0 : i32
    %c0_i32_0 = arith.constant 0 : i32
    %c0_i32_1 = arith.constant 0 : i32
    return %arg0, %c0_i32, %c0_i32_0 : i32, i32, i32
  }
  func.func @transform_2(%arg0: i32) -> (i32, i32) {
    %c0_i32 = arith.constant 0 : i32
    %c0_i32_0 = arith.constant 0 : i32
    %c0_i32_1 = arith.constant 0 : i32
    return %c0_i32, %c0_i32_0 : i32, i32
  }
  func.func @transform_3(%arg0: i32) -> (i32, i32) {
    %c0_i32 = arith.constant 0 : i32
    %c0_i32_0 = arith.constant 0 : i32
    %c0_i32_1 = arith.constant 0 : i32
    return %c0_i32, %c0_i32_0 : i32, i32
  }
  func.func @transform_4(%arg0: i32) -> (i32, i32) {
    %c0_i32 = arith.constant 0 : i32
    %c0_i32_0 = arith.constant 0 : i32
    %c0_i32_1 = arith.constant 0 : i32
    return %c0_i32, %c0_i32_0 : i32, i32
  }
  func.func @transform_5(%arg0: i32) -> (i32, i32) {
    %c0_i32 = arith.constant 0 : i32
    %c0_i32_0 = arith.constant 0 : i32
    %c0_i32_1 = arith.constant 0 : i32
    return %c0_i32, %c0_i32_0 : i32, i32
  }
  func.func @transform_6(%arg0: i32) -> (i32, i32) {
    %c0_i32 = arith.constant 0 : i32
    %c0_i32_0 = arith.constant 0 : i32
    %c0_i32_1 = arith.constant 0 : i32
    return %c0_i32, %c0_i32_0 : i32, i32
  }
  func.func @transform_7(%arg0: i32) -> (i32, i32) {
    %c0_i32 = arith.constant 0 : i32
    %c0_i32_0 = arith.constant 0 : i32
    %c0_i32_1 = arith.constant 0 : i32
    return %c0_i32, %c0_i32_0 : i32, i32
  }
  func.func @transform_8(%arg0: i32) -> (i32, i32) {
    %c0_i32 = arith.constant 0 : i32
    %c0_i32_0 = arith.constant 0 : i32
    %c0_i32_1 = arith.constant 0 : i32
    return %c0_i32, %c0_i32_0 : i32, i32
  }
  func.func @transform_9(%arg0: i32) -> (i32, i32) {
    %c0_i32 = arith.constant 0 : i32
    %c0_i32_0 = arith.constant 0 : i32
    %c0_i32_1 = arith.constant 0 : i32
    return %c0_i32, %c0_i32_0 : i32, i32
  }
  func.func @transform_10(%arg0: i32) -> (i32, i32) {
    %c0_i32 = arith.constant 0 : i32
    %c0_i32_0 = arith.constant 0 : i32
    %c0_i32_1 = arith.constant 0 : i32
    return %c0_i32, %c0_i32_0 : i32, i32
  }
  func.func @transform_11(%arg0: i32) -> (i32, i32) {
    %c0_i32 = arith.constant 0 : i32
    %c0_i32_0 = arith.constant 0 : i32
    %c0_i32_1 = arith.constant 0 : i32
    return %c0_i32, %c0_i32_0 : i32, i32
  }
  func.func @transform_12(%arg0: i32) -> (i32, i32) {
    %c0_i32 = arith.constant 0 : i32
    %c0_i32_0 = arith.constant 0 : i32
    %c0_i32_1 = arith.constant 0 : i32
    return %c0_i32, %c0_i32_0 : i32, i32
  }
  func.func @transform_13(%arg0: i32) -> (i32, i32) {
    %c0_i32 = arith.constant 0 : i32
    %c0_i32_0 = arith.constant 0 : i32
    %c0_i32_1 = arith.constant 0 : i32
    return %c0_i32, %c0_i32_0 : i32, i32
  }
  func.func @transform_14(%arg0: i32) -> (i32, i32) {
    %c0_i32 = arith.constant 0 : i32
    %c0_i32_0 = arith.constant 0 : i32
    %c0_i32_1 = arith.constant 0 : i32
    return %c0_i32, %c0_i32_0 : i32, i32
  }
  func.func @transform_15(%arg0: i32) -> (i32, i32) {
    %c0_i32 = arith.constant 0 : i32
    %c0_i32_0 = arith.constant 0 : i32
    %c0_i32_1 = arith.constant 0 : i32
    return %c0_i32, %c0_i32_0 : i32, i32
  }
  func.func @transform_16(%arg0: i32) -> (i32, i32) {
    %c0_i32 = arith.constant 0 : i32
    %c0_i32_0 = arith.constant 0 : i32
    %c0_i32_1 = arith.constant 0 : i32
    return %c0_i32, %c0_i32_0 : i32, i32
  }
  func.func @transform_17(%arg0: i32) -> (i32, i32) {
    %c0_i32 = arith.constant 0 : i32
    %c0_i32_0 = arith.constant 0 : i32
    %c0_i32_1 = arith.constant 0 : i32
    return %c0_i32, %c0_i32_0 : i32, i32
  }
  func.func @transform_18(%arg0: i32) -> (i32, i32) {
    %c0_i32 = arith.constant 0 : i32
    %c0_i32_0 = arith.constant 0 : i32
    %c0_i32_1 = arith.constant 0 : i32
    return %c0_i32, %c0_i32_0 : i32, i32
  }
  func.func @transform_19(%arg0: i32) -> (i32, i32) {
    %c0_i32 = arith.constant 0 : i32
    %c0_i32_0 = arith.constant 0 : i32
    %c0_i32_1 = arith.constant 0 : i32
    return %c0_i32, %c0_i32_0 : i32, i32
  }
  func.func @transform_20(%arg0: i32) -> (i32, i32) {
    %c0_i32 = arith.constant 0 : i32
    %c0_i32_0 = arith.constant 0 : i32
    %c0_i32_1 = arith.constant 0 : i32
    return %c0_i32, %c0_i32_0 : i32, i32
  }
  func.func @transform_21(%arg0: i32) -> (i32, i32) {
    %c0_i32 = arith.constant 0 : i32
    %c0_i32_0 = arith.constant 0 : i32
    %c0_i32_1 = arith.constant 0 : i32
    return %c0_i32, %c0_i32_0 : i32, i32
  }
  func.func @transform_22(%arg0: i32) -> (i32, i32) {
    %c0_i32 = arith.constant 0 : i32
    %c0_i32_0 = arith.constant 0 : i32
    %c0_i32_1 = arith.constant 0 : i32
    return %c0_i32, %c0_i32_0 : i32, i32
  }
  func.func @transform_23(%arg0: i32) -> (i32, i32) {
    %c0_i32 = arith.constant 0 : i32
    %c0_i32_0 = arith.constant 0 : i32
    %c0_i32_1 = arith.constant 0 : i32
    return %c0_i32, %c0_i32_0 : i32, i32
  }
  func.func @transform_24(%arg0: i32) -> (i32, i32) {
    %c0_i32 = arith.constant 0 : i32
    %c0_i32_0 = arith.constant 0 : i32
    %c0_i32_1 = arith.constant 0 : i32
    return %c0_i32, %c0_i32_0 : i32, i32
  }
  func.func @transform_25(%arg0: i32) -> (i32, i32) {
    %c0_i32 = arith.constant 0 : i32
    %c0_i32_0 = arith.constant 0 : i32
    %c0_i32_1 = arith.constant 0 : i32
    return %c0_i32, %c0_i32_0 : i32, i32
  }
  func.func @transform_26(%arg0: i32) -> (i32, i32) {
    %c0_i32 = arith.constant 0 : i32
    %c0_i32_0 = arith.constant 0 : i32
    %c0_i32_1 = arith.constant 0 : i32
    return %c0_i32, %c0_i32_0 : i32, i32
  }
  func.func @transform_27(%arg0: i32) -> (i32, i32) {
    %c0_i32 = arith.constant 0 : i32
    %c0_i32_0 = arith.constant 0 : i32
    %c0_i32_1 = arith.constant 0 : i32
    return %c0_i32, %c0_i32_0 : i32, i32
  }
  func.func @transform_28(%arg0: i32) -> (i32, i32) {
    %c0_i32 = arith.constant 0 : i32
    %c0_i32_0 = arith.constant 0 : i32
    %c0_i32_1 = arith.constant 0 : i32
    return %c0_i32, %c0_i32_0 : i32, i32
  }
  func.func @transform_29(%arg0: i32) -> (i32, i32, i32) {
    %c0_i32 = arith.constant 0 : i32
    %c0_i32_0 = arith.constant 0 : i32
    %c0_i32_1 = arith.constant 0 : i32
    return %arg0, %c0_i32, %c0_i32_0 : i32, i32, i32
  }
}

</mosaic_0001>

<bundles_post_ra>
// kernel: stable_transformer_encoder_layer_xl.1
= control target key start
LH: loop header
LB: loop body
LE: loop exit
PB: predicated region body
PF: predicated region fallthrough
CT: control target
= control target key end

     0   :  { %s5360_s6 = smov 1   ;;  %s5361_s10 = smov 2   ;;  %s6253_s0 = inlined_call_operand.smem [shape: u32[30], index: -1, kind: input, shape index: {}] }
   0x1   :  { %s5434_s5 = sld [smem:[%s6253_s0]]   ;;  %s5362_s14 = smov 3  }
   0x2   :  { %s5439_s9 = sld [smem:[%s6253_s0 + %s5360_s6]]   ;;  %s5363_s18 = smov 4  }
   0x3   :  { %s5444_s13 = sld [smem:[%s6253_s0 + %s5361_s10]]   ;;  %s5364_s22 = smov 5  }
   0x4   :  { %s5449_s17 = sld [smem:[%s6253_s0 + %s5362_s14]]   ;;  %s5365_s26 = smov 6  }
   0x5   :  { %s5454_s21 = sld [smem:[%s6253_s0 + %s5363_s18]]   ;;  %s5366_s30 = smov 7  }
   0x6   :  { %s5459_s25 = sld [smem:[%s6253_s0 + %s5364_s22]]   ;;  %s5367_s4 = smov 8  }
   0x7   :  { %6269 = sst [smem:[#allocation37_spill]] %s5434_s5  ;;  %s5368_s10 = smov 9  }
   0x8   :  { %6270 = sst [smem:[#allocation38_spill]] %s5439_s9  ;;  %s5369_s15 = smov 10  }
   0x9   :  { %6271 = sst [smem:[#allocation39_spill]] %s5444_s13  ;;  %s5370_s20 = smov 11  }
   0xa   :  { %6272 = sst [smem:[#allocation40_spill]] %s5449_s17  ;;  %s5372_s1 = smov 13  }
   0xb   :  { %6273 = sst [smem:[#allocation41_spill]] %s5454_s21  ;;  %s5373_s7 = smov 14  }
   0xc   :  { %6274 = sst [smem:[#allocation42_spill]] %s5459_s25  ;;  %s5375_s22 = smov 16  }
   0xd   :  { %s5464_s29 = sld [smem:[%s6253_s0 + %s5365_s26]]   ;;  %s5371_s26 = smov 12  }
   0xe   :  { %s5469_s3 = sld [smem:[%s6253_s0 + %s5366_s30]]   ;;  %s5376_s28 = smov 17  }
   0xf   :  { %s5474_s8 = sld [smem:[%s6253_s0 + %s5367_s4]]  }
  0x10   :  { %s5479_s14 = sld [smem:[%s6253_s0 + %s5368_s10]]  }
  0x11   :  { %s5484_s19 = sld [smem:[%s6253_s0 + %s5369_s15]]   ;;  %s5374_s15 = smov 15  }
  0x12   :  { %s5489_s24 = sld [smem:[%s6253_s0 + %s5370_s20]]  }
  0x13   :  { %s5494_s30 = sld [smem:[%s6253_s0 + %s5371_s26]]  }
  0x14   :  { %6275 = sst [smem:[#allocation43_spill]] %s5469_s3 }
  0x15   :  { %6276 = sst [smem:[#allocation44_spill]] %s5474_s8 }
  0x16   :  { %6277 = sst [smem:[#allocation45_spill]] %s5479_s14 }
  0x17   :  { %6278 = sst [smem:[#allocation46_spill]] %s5484_s19 }
  0x18   :  { %s5499_s6 = sld [smem:[%s6253_s0 + %s5372_s1]]  }
  0x19   :  { %s5504_s12 = sld [smem:[%s6253_s0 + %s5373_s7]]   ;;  %s5377_s7 = smov 18  }
  0x1a   :  { %s5509_s20 = sld [smem:[%s6253_s0 + %s5374_s15]]   ;;  %s5378_s15 = smov 19  }
  0x1b   :  { %s5514_s27 = sld [smem:[%s6253_s0 + %s5375_s22]]   ;;  %s5379_s22 = smov 20  }
  0x1c   :  { %s5519_s4 = sld [smem:[%s6253_s0 + %s5376_s28]]   ;;  %s5380_s28 = smov 21  }
  0x1d   :  { %s5524_s19 = sld [smem:[%s6253_s0 + %s5377_s7]]   ;;  %s5381_s7 = smov 22  }
  0x1e   :  { %6279 = sst [smem:[#allocation47_spill]] %s5499_s6 }
  0x1f   :  { %s5529_s17 = sld [smem:[%s6253_s0 + %s5378_s15]]   ;;  %s5382_s15 = smov 23  }
  0x20   :  { %s5534_s21 = sld [smem:[%s6253_s0 + %s5379_s22]]   ;;  %s5383_s22 = smov 24  }
  0x21   :  { %s5539_s9 = sld [smem:[%s6253_s0 + %s5380_s28]]   ;;  %s5384_s28 = smov 25  }
  0x22   :  { %6280 = sst [smem:[#allocation48_spill]] %s5519_s4 }
  0x23   :  { %s5544_s13 = sld [smem:[%s6253_s0 + %s5381_s7]]   ;;  %s5385_s7 = smov 26  }
  0x24   :  { %s5549_s25 = sld [smem:[%s6253_s0 + %s5382_s15]]   ;;  %s5386_s15 = smov 27  }
  0x25   :  { %s5554_s14 = sld [smem:[%s6253_s0 + %s5383_s22]]   ;;  %s5387_s22 = smov 28  }
  0x26   :  { %s5564_s8 = sld [smem:[%s6253_s0 + %s5385_s7]]  }
  0x27   :  { %6281 = sst [smem:[#allocation49_spill]] %s5539_s9 }
  0x28   :  { %s5559_s9 = sld [smem:[%s6253_s0 + %s5384_s28]]   ;;  %s5388_s28 = smov 29  }
  0x29   :  { %s5574_s3 = sld [smem:[%s6253_s0 + %s5387_s22]]  }
  0x2a   :  { %6282 = sst [smem:[#allocation50_spill]] %s5549_s25 }
  0x2b   :  { %s5569_s25 = sld [smem:[%s6253_s0 + %s5386_s15]]  }
  0x2c   :  { %s5579_s5 = sld [smem:[%s6253_s0 + %s5388_s28]]  }
  0x2d   :  { %64 = vsyncpa [#allocation3], 0 }
  0x2e   :  { %65 = vsyncpa [#allocation5], 0 }
  0x2f   :  { %66 = vsyncpa [#allocation8], 0 }
  0x30   :  { %67 = vsyncpa [#allocation11], 0 }
  0x31   :  { %68 = vsyncpa [#allocation14], 0 }
  0x32   :  { %69 = vsyncpa [#allocation17], 0 }
  0x33   :  { %70 = vsyncpa [#allocation20], 0 }
  0x34   :  { %71 = vsyncpa [#allocation23], 0 }
  0x35   :  { %72 = vsyncpa [#allocation26], 0  ;;  %s5581_s7 = smov 0  }
  0x36 LB: > { %s6283_s6 = sld [smem:[#allocation47_spill]]  ;;  %s6284_s4 = sld [smem:[#allocation48_spill]]  ;;  %s5358_s7 = sphi %s5581_s7, %s78_s7  }
  0x37   : > { %s5389_s0 = smov [#allocation4]   ;;  %s5587_s11 = sadd.s32 4294967295, %s5358_s7  }
  0x38   : > { %s775_s10 = sshll.u32 %s5389_s0, 4  ;;  %p3938_p0 = scmp.ge.s32.totalorder %s5358_s7, 1  ;;  %s5592_s10 = int_to_ptr.vmem [resolvable:$true] %s775_s10 }
  0x39   : > { %p728_p1 = scmp.lt.s32.totalorder %s5358_s7, 3  ;;  %p6261_p2 = scmp.eq.s32.totalorder %s5587_s11, 0 }
  0x3a   : > { %s5390_s16 = smov [#allocation7]   ;;  %s5391_s23 = smov [#allocation10]  }
  0x3b   : > { %p5594_p3 = pnand %p3938_p0, %p728_p1  ;;  %s799_s18 = sshll.u32 %s5390_s16, 4  ;;  %s5600_s18 = int_to_ptr.vmem [resolvable:$true] %s799_s18 }
  0x3c   : > { %s823_s26 = sshll.u32 %s5391_s23, 4  ;;  %s5392_s28 = smov [#allocation13]   ;;  %s5608_s26 = int_to_ptr.vmem [resolvable:$true] %s823_s26 }
  0x3d   : > { %s6285_s15 = scalar_select %p5594_p3, 1, 0 }
  0x3e   : > { %p4589_p4 = pneg %p5594_p3  ;;  %s5610_s1 = sshll.u32 %s5392_s28, 4  ;;  %s849_s1 = int_to_ptr.vmem [resolvable:$true] %s5610_s1 }
  0x3f   : > { %s4840_s2 = scalar_lea.hbm %s5489_s24, 512 }
  0x40   : > { %p5604_p5 = pnand %p6261_p2, %p4589_p4  ;;  %p4841_p6 = scmp.ne.s32.totalorder %s5489_s24, %s4840_s2 }
  0x41   : > { %p4847_p10 = scmp.lt.u32.totalorder %s4840_s2, %s5489_s24 }
  0x42   : > { %p5616_p7 = pneg %p5604_p5 }
  0x44   : > { %p4843_p8 = pnand %p5616_p7, %p4841_p6 }
  0x46   : > { %p4844_p9 = pneg %p4843_p8 }
  0x48   : > { %p4849_p11 = pnand %p4847_p10, %p4844_p9 }
  0x4a   : > { %4852 = shalt.err (!%p4849_p11)
}
  0x4b   : > { %s4853_s16 = scalar_lea.vmem %s5592_s10, 512  ;;  %p4861_p1 = scmp.lt.s32.totalorder %s5592_s10, %s5592_s10 }
  0x4c   : > { %p4854_p12 = scmp.ne.s32.totalorder %s5592_s10, %s4853_s16  ;;  %p4862_p4 = scmp.lt.s32.totalorder %s4853_s16, %s4853_s16 }
  0x4e   : > { %p4856_p13 = pnand %p4854_p12, %p5616_p7  ;;  %p4863_p2 = por %p4862_p4, %p4861_p1 }
  0x50   : > { %p4857_p0 = pneg %p4856_p13 }
  0x52   : > { %p4864_p3 = pnand %p4863_p2, %p4857_p0 }
  0x54   : > { %4867 = shalt.err (!%p4864_p3)
}
  0x55   : > { %s6263_s23 = smov 128   ;;  %s6265_s28 = smov 8  }
  0x56   : > { %4595 = dma.hbm_to_vmem [thread:$0]  (!%p5604_p5), %s5489_s24, 512, %s5592_s10, [#allocation5], %s6263_s23, %s6263_s23, %s6265_s28  }
  0x57   : > { %s4868_s2 = scalar_lea.hbm %s6283_s6, 512 }
  0x58   : > { %p4869_p6 = scmp.ne.s32.totalorder %s6283_s6, %s4868_s2  ;;  %p4875_p3 = scmp.lt.u32.totalorder %s4868_s2, %s6283_s6 }
  0x5a   : > { %p4871_p8 = pnand %p4869_p6, %p5616_p7 }
  0x5c   : > { %p4872_p2 = pneg %p4871_p8 }
  0x5e   : > { %p4877_p9 = pnand %p4875_p3, %p4872_p2 }
  0x60   : > { %4880 = shalt.err (!%p4877_p9)
}
  0x61   : > { %s4881_s16 = scalar_lea.vmem %s5600_s18, 512  ;;  %p4889_p13 = scmp.lt.s32.totalorder %s5600_s18, %s5600_s18 }
  0x62   : > { %p4882_p10 = scmp.ne.s32.totalorder %s5600_s18, %s4881_s16  ;;  %p4890_p0 = scmp.lt.s32.totalorder %s4881_s16, %s4881_s16 }
  0x64   : > { %p4884_p11 = pnand %p4882_p10, %p5616_p7  ;;  %p4891_p1 = por %p4890_p0, %p4889_p13 }
  0x66   : > { %p4885_p12 = pneg %p4884_p11 }
  0x68   : > { %p4892_p4 = pnand %p4891_p1, %p4885_p12 }
  0x6a   : > { %4895 = shalt.err (!%p4892_p4)
}
  0x6b   : > { %4601 = dma.hbm_to_vmem [thread:$0]  (!%p5604_p5), %s6283_s6, 512, %s5600_s18, [#allocation8], %s6263_s23, %s6263_s23, %s6265_s28  }
  0x6c   : > { %s4896_s10 = scalar_lea.hbm %s5509_s20, 512 }
  0x6d   : > { %p4897_p6 = scmp.ne.s32.totalorder %s5509_s20, %s4896_s10  ;;  %p4903_p3 = scmp.lt.u32.totalorder %s4896_s10, %s5509_s20 }
  0x6f   : > { %p4899_p8 = pnand %p4897_p6, %p5616_p7 }
  0x71   : > { %p4900_p2 = pneg %p4899_p8 }
  0x73   : > { %p4905_p9 = pnand %p4903_p3, %p4900_p2 }
  0x75   : > { %4908 = shalt.err (!%p4905_p9)
}
  0x76   : > { %s4909_s2 = scalar_lea.vmem %s5608_s26, 512  ;;  %p4917_p13 = scmp.lt.s32.totalorder %s5608_s26, %s5608_s26 }
  0x77   : > { %p4910_p10 = scmp.ne.s32.totalorder %s5608_s26, %s4909_s2  ;;  %p4918_p0 = scmp.lt.s32.totalorder %s4909_s2, %s4909_s2 }
  0x79   : > { %p4912_p11 = pnand %p4910_p10, %p5616_p7  ;;  %p4919_p1 = por %p4918_p0, %p4917_p13 }
  0x7b   : > { %p4913_p12 = pneg %p4912_p11 }
  0x7d   : > { %p4920_p4 = pnand %p4919_p1, %p4913_p12 }
  0x7f   : > { %4923 = shalt.err (!%p4920_p4)
}
  0x80   : > { %4607 = dma.hbm_to_vmem [thread:$0]  (!%p5604_p5), %s5509_s20, 512, %s5608_s26, [#allocation11], %s6263_s23, %s6263_s23, %s6265_s28  }
  0x81   : > { %s4924_s18 = scalar_lea.hbm %s6284_s4, 16 }
  0x82   : > { %p4925_p6 = scmp.ne.s32.totalorder %s6284_s4, %s4924_s18  ;;  %p4931_p3 = scmp.lt.u32.totalorder %s4924_s18, %s6284_s4 }
  0x84   : > { %p4927_p8 = pnand %p4925_p6, %p5616_p7 }
  0x86   : > { %p4928_p2 = pneg %p4927_p8 }
  0x88   : > { %p4933_p9 = pnand %p4931_p3, %p4928_p2 }
  0x8a   : > { %4936 = shalt.err (!%p4933_p9)
}
  0x8b   : > { %s4937_s16 = scalar_lea.vmem %s849_s1, 16  ;;  %s4944_s10 = scalar_lea.vmem %s849_s1, 32 }
  0x8c   : > { %p4938_p10 = scmp.ne.s32.totalorder %s849_s1, %s4937_s16  ;;  %p4945_p13 = scmp.lt.s32.totalorder %s849_s1, %s849_s1 }
  0x8d   : > { %p4946_p0 = scmp.lt.s32.totalorder %s4944_s10, %s4937_s16 }
  0x8e   : > { %p4940_p11 = pnand %p4938_p10, %p5616_p7 }
  0x8f   : > { %p4947_p1 = por %p4946_p0, %p4945_p13 }
  0x90   : > { %p4941_p12 = pneg %p4940_p11 }
  0x92   : > { %p4948_p4 = pnand %p4947_p1, %p4941_p12 }
  0x94   : > { %4951 = shalt.err (!%p4948_p4)
}
  0x95   : > { %4613 = dma.hbm_to_vmem [thread:$0]  (!%p5604_p5), %s6284_s4, 16, %s849_s1, [#allocation14]  }
  0x96   : > { %s5395_s26 = smov [#allocation16]   ;;  %s5396_s18 = smov [#allocation19]  }
  0x97   : > { %s869_s2 = sshll.u32 %s5395_s26, 4  ;;  %s897_s23 = sshll.u32 %s5396_s18, 4  ;;  %s870_s2 = int_to_ptr.vmem [resolvable:$true] %s869_s2  ;;  %s898_s23 = int_to_ptr.vmem [resolvable:$true] %s897_s23 }
  0x98   : > { %s4952_s28 = scalar_lea.hbm %s5529_s17, 512 }
  0x99   : > { %p4953_p6 = scmp.ne.s32.totalorder %s5529_s17, %s4952_s28  ;;  %p4959_p3 = scmp.lt.u32.totalorder %s4952_s28, %s5529_s17 }
  0x9b   : > { %p4955_p8 = pnand %p4953_p6, %p5616_p7 }
  0x9d   : > { %p4956_p2 = pneg %p4955_p8 }
  0x9f   : > { %p4961_p9 = pnand %p4959_p3, %p4956_p2 }
  0xa1   : > { %4964 = shalt.err (!%p4961_p9)
}
  0xa2   : > { %s4965_s16 = scalar_lea.vmem %s870_s2, 512  ;;  %p4973_p13 = scmp.lt.s32.totalorder %s870_s2, %s870_s2 }
  0xa3   : > { %p4966_p10 = scmp.ne.s32.totalorder %s870_s2, %s4965_s16  ;;  %p4974_p0 = scmp.lt.s32.totalorder %s4965_s16, %s4965_s16 }
  0xa5   : > { %p4968_p11 = pnand %p4966_p10, %p5616_p7  ;;  %p4975_p1 = por %p4974_p0, %p4973_p13 }
  0xa7   : > { %p4969_p12 = pneg %p4968_p11 }
  0xa9   : > { %p4976_p4 = pnand %p4975_p1, %p4969_p12 }
  0xab   : > { %4979 = shalt.err (!%p4976_p4)
}
  0xac   : > { %s6288_s1 = smov 8   ;;  %s6289_s10 = smov 128  }
  0xad   : > { %4619 = dma.hbm_to_vmem [thread:$0]  (!%p5604_p5), %s5529_s17, 512, %s870_s2, [#allocation17], %s6289_s10, %s6289_s10, %s6288_s1  }
  0xae   : > { %s4980_s28 = scalar_lea.hbm %s5544_s13, 16 }
  0xaf   : > { %p4981_p6 = scmp.ne.s32.totalorder %s5544_s13, %s4980_s28  ;;  %p4987_p3 = scmp.lt.u32.totalorder %s4980_s28, %s5544_s13 }
  0xb1   : > { %p4983_p8 = pnand %p4981_p6, %p5616_p7 }
  0xb3   : > { %p4984_p2 = pneg %p4983_p8 }
  0xb5   : > { %p4989_p9 = pnand %p4987_p3, %p4984_p2 }
  0xb7   : > { %4992 = shalt.err (!%p4989_p9)
}
  0xb8   : > { %s4993_s26 = scalar_lea.vmem %s898_s23, 16  ;;  %s5000_s18 = scalar_lea.vmem %s898_s23, 32 }
  0xb9   : > { %p4994_p10 = scmp.ne.s32.totalorder %s898_s23, %s4993_s26  ;;  %p5001_p13 = scmp.lt.s32.totalorder %s898_s23, %s898_s23 }
  0xba   : > { %p5002_p0 = scmp.lt.s32.totalorder %s5000_s18, %s4993_s26 }
  0xbb   : > { %p4996_p11 = pnand %p4994_p10, %p5616_p7 }
  0xbc   : > { %p5003_p1 = por %p5002_p0, %p5001_p13 }
  0xbd   : > { %p4997_p12 = pneg %p4996_p11 }
  0xbf   : > { %p5004_p4 = pnand %p5003_p1, %p4997_p12 }
  0xc1   : > { %5007 = shalt.err (!%p5004_p4)
}
  0xc2   : > { %4625 = dma.hbm_to_vmem [thread:$0]  (!%p5604_p5), %s5544_s13, 16, %s898_s23, [#allocation20]  }
  0xc3   : > { %s5397_s2 = smov [#allocation22]   ;;  %s5398_s28 = smov [#allocation25]  }
  0xc4   : > { %s921_s16 = sshll.u32 %s5397_s2, 4  ;;  %s945_s4 = sshll.u32 %s5398_s28, 4  ;;  %s922_s16 = int_to_ptr.vmem [resolvable:$true] %s921_s16  ;;  %s946_s4 = int_to_ptr.vmem [resolvable:$true] %s945_s4 }
  0xc5   : > { %s5008_s6 = scalar_lea.hbm %s5559_s9, 512 }
  0xc6   : > { %p5009_p6 = scmp.ne.s32.totalorder %s5559_s9, %s5008_s6  ;;  %p5015_p3 = scmp.lt.u32.totalorder %s5008_s6, %s5559_s9 }
  0xc8   : > { %p5011_p8 = pnand %p5009_p6, %p5616_p7 }
  0xca   : > { %p5012_p2 = pneg %p5011_p8 }
  0xcc   : > { %p5017_p9 = pnand %p5015_p3, %p5012_p2 }
  0xce   : > { %5020 = shalt.err (!%p5017_p9)
}
  0xcf   : > { %s5021_s26 = scalar_lea.vmem %s922_s16, 512  ;;  %p5029_p13 = scmp.lt.s32.totalorder %s922_s16, %s922_s16 }
  0xd0   : > { %p5022_p10 = scmp.ne.s32.totalorder %s922_s16, %s5021_s26  ;;  %p5030_p0 = scmp.lt.s32.totalorder %s5021_s26, %s5021_s26 }
  0xd2   : > { %p5024_p11 = pnand %p5022_p10, %p5616_p7  ;;  %p5031_p1 = por %p5030_p0, %p5029_p13 }
  0xd4   : > { %p5025_p12 = pneg %p5024_p11 }
  0xd6   : > { %p5032_p4 = pnand %p5031_p1, %p5025_p12 }
  0xd8   : > { %5035 = shalt.err (!%p5032_p4)
}
  0xd9   : > { %4631 = dma.hbm_to_vmem [thread:$0]  (!%p5604_p5), %s5559_s9, 512, %s922_s16, [#allocation23], %s6289_s10, %s6289_s10, %s6288_s1  }
  0xda   : > { %s5036_s6 = scalar_lea.hbm %s5569_s25, 512 }
  0xdb   : > { %p5037_p6 = scmp.ne.s32.totalorder %s5569_s25, %s5036_s6  ;;  %p5043_p3 = scmp.lt.u32.totalorder %s5036_s6, %s5569_s25 }
  0xdd   : > { %p5039_p8 = pnand %p5037_p6, %p5616_p7 }
  0xdf   : > { %p5040_p2 = pneg %p5039_p8 }
  0xe1   : > { %p5045_p9 = pnand %p5043_p3, %p5040_p2 }
  0xe3   : > { %5048 = shalt.err (!%p5045_p9)
}
  0xe4   : > { %s5049_s23 = scalar_lea.vmem %s946_s4, 512  ;;  %p5057_p13 = scmp.lt.s32.totalorder %s946_s4, %s946_s4 }
  0xe5   : > { %p5050_p10 = scmp.ne.s32.totalorder %s946_s4, %s5049_s23  ;;  %p5058_p0 = scmp.lt.s32.totalorder %s5049_s23, %s5049_s23 }
  0xe7   : > { %p5052_p11 = pnand %p5050_p10, %p5616_p7  ;;  %p5059_p1 = por %p5058_p0, %p5057_p13 }
  0xe9   : > { %p5053_p12 = pneg %p5052_p11 }
  0xeb   : > { %p5060_p4 = pnand %p5059_p1, %p5053_p12 }
  0xed   : > { %5063 = shalt.err (!%p5060_p4)
}
  0xee   : > { %4637 = dma.hbm_to_vmem [thread:$0]  (!%p5604_p5), %s5569_s25, 512, %s946_s4, [#allocation26], %s6289_s10, %s6289_s10, %s6288_s1  }
  0xef   : > { %s5399_s18 = smov [#allocation2]   ;;  %s5400_s16 = smov [#allocation6]  }
  0xf0   : > { %s753_s2 = sshll.u32 %s5399_s18, 4  ;;  %s789_s28 = sshll.u32 %s5400_s16, 4  ;;  %s754_s2 = int_to_ptr.vmem [resolvable:$true] %s753_s2  ;;  %s790_s28 = int_to_ptr.vmem [resolvable:$true] %s789_s28 }
  0xf1   : > { %s5064_s26 = scalar_lea.hbm %s5464_s29, 16 }
  0xf2   : > { %p5065_p6 = scmp.ne.s32.totalorder %s5464_s29, %s5064_s26  ;;  %p5071_p3 = scmp.lt.u32.totalorder %s5064_s26, %s5464_s29 }
  0xf4   : > { %p5067_p8 = pnand %p5065_p6, %p5616_p7 }
  0xf6   : > { %p5068_p2 = pneg %p5067_p8 }
  0xf8   : > { %p5073_p9 = pnand %p5071_p3, %p5068_p2 }
  0xfa   : > { %5076 = shalt.err (!%p5073_p9)
}
  0xfb   : > { %s5077_s6 = scalar_lea.vmem %s754_s2, 16  ;;  %s5084_s4 = scalar_lea.vmem %s754_s2, 32 }
  0xfc   : > { %p5078_p10 = scmp.ne.s32.totalorder %s754_s2, %s5077_s6  ;;  %p5085_p13 = scmp.lt.s32.totalorder %s754_s2, %s754_s2 }
  0xfd   : > { %p5086_p0 = scmp.lt.s32.totalorder %s5084_s4, %s5077_s6 }
  0xfe   : > { %p5080_p11 = pnand %p5078_p10, %p5616_p7 }
  0xff   : > { %p5087_p1 = por %p5086_p0, %p5085_p13 }
 0x100   : > { %p5081_p12 = pneg %p5080_p11 }
 0x102   : > { %p5088_p4 = pnand %p5087_p1, %p5081_p12 }
 0x104   : > { %5091 = shalt.err (!%p5088_p4)
}
 0x105   : > { %4592 = dma.hbm_to_vmem [thread:$0]  (!%p5604_p5), %s5464_s29, 16, %s754_s2, [#allocation3]  }
 0x106   : > { %s5092_s1 = scalar_lea.hbm %s5494_s30, 16 }
 0x107   : > { %p5093_p6 = scmp.ne.s32.totalorder %s5494_s30, %s5092_s1  ;;  %p5099_p3 = scmp.lt.u32.totalorder %s5092_s1, %s5494_s30 }
 0x109   : > { %p5095_p8 = pnand %p5093_p6, %p5616_p7 }
 0x10b   : > { %p5096_p2 = pneg %p5095_p8 }
 0x10d   : > { %p5101_p9 = pnand %p5099_p3, %p5096_p2 }
 0x10f   : > { %5104 = shalt.err (!%p5101_p9)
}
 0x110   : > { %s5105_s10 = scalar_lea.vmem %s790_s28, 16  ;;  %s5112_s23 = scalar_lea.vmem %s790_s28, 32 }
 0x111   : > { %p5106_p10 = scmp.ne.s32.totalorder %s790_s28, %s5105_s10  ;;  %p5113_p13 = scmp.lt.s32.totalorder %s790_s28, %s790_s28 }
 0x112   : > { %p5114_p0 = scmp.lt.s32.totalorder %s5112_s23, %s5105_s10 }
 0x113   : > { %p5108_p11 = pnand %p5106_p10, %p5616_p7 }
 0x114   : > { %p5115_p1 = por %p5114_p0, %p5113_p13 }
 0x115   : > { %p5109_p12 = pneg %p5108_p11 }
 0x117   : > { %p5116_p4 = pnand %p5115_p1, %p5109_p12 }
 0x119   : > { %5119 = shalt.err (!%p5116_p4)
}
 0x11a   : > { %4598 = dma.hbm_to_vmem [thread:$0]  (!%p5604_p5), %s5494_s30, 16, %s790_s28, [#allocation5]  }
 0x11b   : > { %s5401_s18 = smov [#allocation9]   ;;  %s5402_s16 = smov [#allocation12]  }
 0x11c   : > { %s813_s2 = sshll.u32 %s5401_s18, 4  ;;  %s837_s26 = sshll.u32 %s5402_s16, 4  ;;  %s814_s2 = int_to_ptr.vmem [resolvable:$true] %s813_s2  ;;  %s838_s26 = int_to_ptr.vmem [resolvable:$true] %s837_s26 }
 0x11d   : > { %s5120_s6 = scalar_lea.hbm %s5504_s12, 16 }
 0x11e   : > { %p5121_p6 = scmp.ne.s32.totalorder %s5504_s12, %s5120_s6  ;;  %p5127_p3 = scmp.lt.u32.totalorder %s5120_s6, %s5504_s12 }
 0x120   : > { %p5123_p8 = pnand %p5121_p6, %p5616_p7 }
 0x122   : > { %p5124_p2 = pneg %p5123_p8 }
 0x124   : > { %p5129_p9 = pnand %p5127_p3, %p5124_p2 }
 0x126   : > { %5132 = shalt.err (!%p5129_p9)
}
 0x127   : > { %s5133_s4 = scalar_lea.vmem %s814_s2, 16  ;;  %s5140_s28 = scalar_lea.vmem %s814_s2, 32 }
 0x128   : > { %p5134_p10 = scmp.ne.s32.totalorder %s814_s2, %s5133_s4  ;;  %p5141_p13 = scmp.lt.s32.totalorder %s814_s2, %s814_s2 }
 0x129   : > { %p5142_p0 = scmp.lt.s32.totalorder %s5140_s28, %s5133_s4 }
 0x12a   : > { %p5136_p11 = pnand %p5134_p10, %p5616_p7 }
 0x12b   : > { %p5143_p1 = por %p5142_p0, %p5141_p13 }
 0x12c   : > { %p5137_p12 = pneg %p5136_p11 }
 0x12e   : > { %p5144_p4 = pnand %p5143_p1, %p5137_p12 }
 0x130   : > { %5147 = shalt.err (!%p5144_p4)
}
 0x131   : > { %4604 = dma.hbm_to_vmem [thread:$0]  (!%p5604_p5), %s5504_s12, 16, %s814_s2, [#allocation8]  }
 0x132   : > { %s5148_s1 = scalar_lea.hbm %s5514_s27, 16 }
 0x133   : > { %p5149_p6 = scmp.ne.s32.totalorder %s5514_s27, %s5148_s1  ;;  %p5155_p3 = scmp.lt.u32.totalorder %s5148_s1, %s5514_s27 }
 0x135   : > { %p5151_p8 = pnand %p5149_p6, %p5616_p7 }
 0x137   : > { %p5152_p2 = pneg %p5151_p8 }
 0x139   : > { %p5157_p9 = pnand %p5155_p3, %p5152_p2 }
 0x13b   : > { %5160 = shalt.err (!%p5157_p9)
}
 0x13c   : > { %s5161_s10 = scalar_lea.vmem %s838_s26, 16  ;;  %s5168_s23 = scalar_lea.vmem %s838_s26, 32 }
 0x13d   : > { %p5162_p10 = scmp.ne.s32.totalorder %s838_s26, %s5161_s10  ;;  %p5169_p13 = scmp.lt.s32.totalorder %s838_s26, %s838_s26 }
 0x13e   : > { %p5170_p0 = scmp.lt.s32.totalorder %s5168_s23, %s5161_s10 }
 0x13f   : > { %p5164_p11 = pnand %p5162_p10, %p5616_p7 }
 0x140   : > { %p5171_p1 = por %p5170_p0, %p5169_p13 }
 0x141   : > { %p5165_p12 = pneg %p5164_p11 }
 0x143   : > { %p5172_p4 = pnand %p5171_p1, %p5165_p12 }
 0x145   : > { %5175 = shalt.err (!%p5172_p4)
}
 0x146   : > { %4610 = dma.hbm_to_vmem [thread:$0]  (!%p5604_p5), %s5514_s27, 16, %s838_s26, [#allocation11]  }
 0x147   : > { %s5403_s18 = smov [#allocation15]   ;;  %s5404_s16 = smov [#allocation18]  }
 0x148   : > { %s859_s2 = sshll.u32 %s5403_s18, 4  ;;  %s883_s6 = sshll.u32 %s5404_s16, 4  ;;  %s860_s2 = int_to_ptr.vmem [resolvable:$true] %s859_s2  ;;  %s884_s6 = int_to_ptr.vmem [resolvable:$true] %s883_s6 }
 0x149   : > { %s5176_s4 = scalar_lea.hbm %s5524_s19, 16 }
 0x14a   : > { %p5177_p6 = scmp.ne.s32.totalorder %s5524_s19, %s5176_s4  ;;  %p5183_p3 = scmp.lt.u32.totalorder %s5176_s4, %s5524_s19 }
 0x14c   : > { %p5179_p8 = pnand %p5177_p6, %p5616_p7 }
 0x14e   : > { %p5180_p2 = pneg %p5179_p8 }
 0x150   : > { %p5185_p9 = pnand %p5183_p3, %p5180_p2 }
 0x152   : > { %5188 = shalt.err (!%p5185_p9)
}
 0x153   : > { %s5189_s28 = scalar_lea.vmem %s860_s2, 16  ;;  %s5196_s26 = scalar_lea.vmem %s860_s2, 32 }
 0x154   : > { %p5190_p10 = scmp.ne.s32.totalorder %s860_s2, %s5189_s28  ;;  %p5197_p13 = scmp.lt.s32.totalorder %s860_s2, %s860_s2 }
 0x155   : > { %p5198_p0 = scmp.lt.s32.totalorder %s5196_s26, %s5189_s28 }
 0x156   : > { %p5192_p11 = pnand %p5190_p10, %p5616_p7 }
 0x157   : > { %p5199_p1 = por %p5198_p0, %p5197_p13 }
 0x158   : > { %p5193_p12 = pneg %p5192_p11 }
 0x15a   : > { %p5200_p4 = pnand %p5199_p1, %p5193_p12 }
 0x15c   : > { %5203 = shalt.err (!%p5200_p4)
}
 0x15d   : > { %4616 = dma.hbm_to_vmem [thread:$0]  (!%p5604_p5), %s5524_s19, 16, %s860_s2, [#allocation14]  }
 0x15e   : > { %s5204_s1 = scalar_lea.hbm %s5534_s21, 16 }
 0x15f   : > { %p5205_p6 = scmp.ne.s32.totalorder %s5534_s21, %s5204_s1  ;;  %p5211_p3 = scmp.lt.u32.totalorder %s5204_s1, %s5534_s21 }
 0x161   : > { %p5207_p8 = pnand %p5205_p6, %p5616_p7 }
 0x163   : > { %p5208_p2 = pneg %p5207_p8 }
 0x165   : > { %p5213_p9 = pnand %p5211_p3, %p5208_p2 }
 0x167   : > { %5216 = shalt.err (!%p5213_p9)
}
 0x168   : > { %s5217_s10 = scalar_lea.vmem %s884_s6, 16  ;;  %s5224_s23 = scalar_lea.vmem %s884_s6, 32 }
 0x169   : > { %p5218_p10 = scmp.ne.s32.totalorder %s884_s6, %s5217_s10  ;;  %p5225_p13 = scmp.lt.s32.totalorder %s884_s6, %s884_s6 }
 0x16a   : > { %p5226_p0 = scmp.lt.s32.totalorder %s5224_s23, %s5217_s10 }
 0x16b   : > { %p5220_p11 = pnand %p5218_p10, %p5616_p7 }
 0x16c   : > { %p5227_p1 = por %p5226_p0, %p5225_p13 }
 0x16d   : > { %p5221_p12 = pneg %p5220_p11 }
 0x16f   : > { %p5228_p4 = pnand %p5227_p1, %p5221_p12 }
 0x171   : > { %5231 = shalt.err (!%p5228_p4)
}
 0x172   : > { %4622 = dma.hbm_to_vmem [thread:$0]  (!%p5604_p5), %s5534_s21, 16, %s884_s6, [#allocation17]  }
 0x173   : > { %s5405_s18 = smov [#allocation21]   ;;  %s5406_s16 = smov [#allocation24]  }
 0x174   : > { %s911_s2 = sshll.u32 %s5405_s18, 4  ;;  %s935_s4 = sshll.u32 %s5406_s16, 4  ;;  %s912_s2 = int_to_ptr.vmem [resolvable:$true] %s911_s2  ;;  %s936_s4 = int_to_ptr.vmem [resolvable:$true] %s935_s4 }
 0x175   : > { %s5232_s28 = scalar_lea.hbm %s5554_s14, 16 }
 0x176   : > { %p5233_p6 = scmp.ne.s32.totalorder %s5554_s14, %s5232_s28  ;;  %p5239_p3 = scmp.lt.u32.totalorder %s5232_s28, %s5554_s14 }
 0x178   : > { %p5235_p8 = pnand %p5233_p6, %p5616_p7 }
 0x17a   : > { %p5236_p2 = pneg %p5235_p8 }
 0x17c   : > { %p5241_p9 = pnand %p5239_p3, %p5236_p2 }
 0x17e   : > { %5244 = shalt.err (!%p5241_p9)
}
 0x17f   : > { %s5245_s26 = scalar_lea.vmem %s912_s2, 16  ;;  %s5252_s6 = scalar_lea.vmem %s912_s2, 32 }
 0x180   : > { %p5246_p10 = scmp.ne.s32.totalorder %s912_s2, %s5245_s26  ;;  %p5253_p13 = scmp.lt.s32.totalorder %s912_s2, %s912_s2 }
 0x181   : > { %p5254_p0 = scmp.lt.s32.totalorder %s5252_s6, %s5245_s26 }
 0x182   : > { %p5248_p11 = pnand %p5246_p10, %p5616_p7 }
 0x183   : > { %p5255_p1 = por %p5254_p0, %p5253_p13 }
 0x184   : > { %p5249_p12 = pneg %p5248_p11 }
 0x186   : > { %p5256_p4 = pnand %p5255_p1, %p5249_p12 }
 0x188   : > { %5259 = shalt.err (!%p5256_p4)
}
 0x189   : > { %4628 = dma.hbm_to_vmem [thread:$0]  (!%p5604_p5), %s5554_s14, 16, %s912_s2, [#allocation20]  }
 0x18a   : > { %s5260_s1 = scalar_lea.hbm %s5564_s8, 16 }
 0x18b   : > { %p5261_p6 = scmp.ne.s32.totalorder %s5564_s8, %s5260_s1  ;;  %p5267_p3 = scmp.lt.u32.totalorder %s5260_s1, %s5564_s8 }
 0x18d   : > { %p5263_p8 = pnand %p5261_p6, %p5616_p7 }
 0x18f   : > { %p5264_p2 = pneg %p5263_p8 }
 0x191   : > { %p5269_p9 = pnand %p5267_p3, %p5264_p2 }
 0x193   : > { %5272 = shalt.err (!%p5269_p9)
}
 0x194   : > { %s5273_s10 = scalar_lea.vmem %s936_s4, 16  ;;  %s5280_s23 = scalar_lea.vmem %s936_s4, 32 }
 0x195   : > { %p5274_p10 = scmp.ne.s32.totalorder %s936_s4, %s5273_s10  ;;  %p5281_p13 = scmp.lt.s32.totalorder %s936_s4, %s936_s4 }
 0x196   : > { %p5282_p0 = scmp.lt.s32.totalorder %s5280_s23, %s5273_s10 }
 0x197   : > { %p5276_p11 = pnand %p5274_p10, %p5616_p7 }
 0x198   : > { %p5283_p1 = por %p5282_p0, %p5281_p13 }
 0x199   : > { %p5277_p12 = pneg %p5276_p11 }
 0x19b   : > { %p5284_p4 = pnand %p5283_p1, %p5277_p12 }
 0x19d   : > { %5287 = shalt.err (!%p5284_p4)
}
 0x19e   : > { %4634 = dma.hbm_to_vmem [thread:$0]  (!%p5604_p5), %s5564_s8, 16, %s936_s4, [#allocation23]  }
 0x19f   : > { %s5407_s18 = smov [#allocation27]   ;;  %s5288_s16 = scalar_lea.hbm %s5574_s3, 16 }
 0x1a0   : > { %s959_s2 = sshll.u32 %s5407_s18, 4  ;;  %p5289_p6 = scmp.ne.s32.totalorder %s5574_s3, %s5288_s16  ;;  %s960_s2 = int_to_ptr.vmem [resolvable:$true] %s959_s2 }
 0x1a1   : > { %p5295_p3 = scmp.lt.u32.totalorder %s5288_s16, %s5574_s3 }
 0x1a2   : > { %p5291_p8 = pnand %p5289_p6, %p5616_p7 }
 0x1a4   : > { %p5292_p2 = pneg %p5291_p8 }
 0x1a6   : > { %p5297_p9 = pnand %p5295_p3, %p5292_p2 }
 0x1a8   : > { %5300 = shalt.err (!%p5297_p9)
}
 0x1a9   : > { %s5301_s28 = scalar_lea.vmem %s960_s2, 16  ;;  %s5308_s26 = scalar_lea.vmem %s960_s2, 32 }
 0x1aa   : > { %p5302_p10 = scmp.ne.s32.totalorder %s960_s2, %s5301_s28  ;;  %p5309_p13 = scmp.lt.s32.totalorder %s960_s2, %s960_s2 }
 0x1ab   : > { %p5310_p0 = scmp.lt.s32.totalorder %s5308_s26, %s5301_s28 }
 0x1ac   : > { %p5304_p11 = pnand %p5302_p10, %p5616_p7 }
 0x1ad   : > { %p5311_p1 = por %p5310_p0, %p5309_p13 }
 0x1ae   : > { %p5305_p12 = pneg %p5304_p11 }
 0x1b0   : > { %p5312_p4 = pnand %p5311_p1, %p5305_p12 }
 0x1b2   : > { %5315 = shalt.err (!%p5312_p4)
}
 0x1b3   : > { %4640 = dma.hbm_to_vmem [thread:$0]  (!%p5604_p5), %s5574_s3, 16, %s960_s2, [#allocation26]  }
 0x1b4   : > { %p6290_p6 = scmp.ne.s32.totalorder %s6285_s15, 0 }
 0x1b5   : > { %p6291_p8 = scmp.eq.s32.totalorder (!%p6290_p6), %s5587_s11, 0 }
 0x1b6   : > { %986 = sbr.rel (%p6290_p6) target bundleno = 5783 (0x1697), region = 136 }
 0x1bd   : > { %5321 = dma.done.wait (%p6291_p8), [#allocation3], 16   ;;  %p6292_p2 = pmov %p6291_p8 }
 0x1bf   : > { %5323 = vsyncadd (%p6292_p2), [#allocation3], 4294967280  ;;  %p6293_p7 = pmov %p6292_p2 }
 0x1c0   : > { %p6294_p3 = pmov %p6292_p2 }
 0x1c1   : > { %5325 = dma.done.wait (%p6293_p7), [#allocation5], 528  }
 0x1c2   : > { %5327 = vsyncadd (%p6294_p3), [#allocation5], 4294966768  ;;  %p6295_p9 = pmov %p6292_p2 }
 0x1c3   : > { %p6296_p5 = pmov %p6292_p2 }
 0x1c4   : > { %5329 = dma.done.wait (%p6295_p9), [#allocation8], 528  }
 0x1c5   : > { %5331 = vsyncadd (%p6296_p5), [#allocation8], 4294966768  ;;  %p6297_p10 = pmov %p6292_p2 }
 0x1c6   : > { %p6298_p11 = pmov %p6292_p2 }
 0x1c7   : > { %5333 = dma.done.wait (%p6297_p10), [#allocation11], 528  }
 0x1c8   : > { %5335 = vsyncadd (%p6298_p11), [#allocation11], 4294966768  ;;  %p6299_p12 = pmov %p6292_p2 }
 0x1c9   : > { %p6300_p13 = pmov %p6292_p2 }
 0x1ca   : > { %5337 = dma.done.wait (%p6299_p12), [#allocation14], 32  }
 0x1cb   : > { %5339 = vsyncadd (%p6300_p13), [#allocation14], 4294967264  ;;  %p6301_p0 = pmov %p6292_p2 }
 0x1cd   : > { %5341 = dma.done.wait (%p6301_p0), [#allocation17], 528   ;;  %p6302_p1 = pmov %p6301_p0 }
 0x1ce   : > { %p6303_p4 = pmov %p6301_p0 }
 0x1cf   : > { %5343 = vsyncadd (%p6302_p1), [#allocation17], 4294966768 }
 0x1d0   : > { %5345 = dma.done.wait (%p6303_p4), [#allocation20], 32   ;;  %p6304_p6 = pmov %p6301_p0 }
 0x1d1   : > { %p6305_p8 = pmov %p6301_p0 }
 0x1d2   : > { %5347 = vsyncadd (%p6304_p6), [#allocation20], 4294967264 }
 0x1d3   : > { %5349 = dma.done.wait (%p6305_p8), [#allocation23], 528   ;;  %p6306_p2 = pmov %p6301_p0 }
 0x1d4   : > { %p6307_p7 = pmov %p6301_p0 }
 0x1d5   : > { %5351 = vsyncadd (%p6306_p2), [#allocation23], 4294966768 }
 0x1d6   : > { %5353 = dma.done.wait (%p6307_p7), [#allocation26], 528   ;;  %p6308_p3 = pmov %p6301_p0 }
 0x1d7   : > { %s6309_s15 = sld [smem:[#allocation37_spill]]  ;;  %s6310_s22 = sld [smem:[#allocation43_spill]]  ;;  %vm1142_vm0 = vcmask 261120   ;;  %v5408_v10 = vmov 0.0|0.0   ;;  %vm5409_vm1 = vmmov 0   ;;  %v5410_v18 = vmov 0.0  }
 0x1d8   : > { %5355 = vsyncadd (%p6308_p3), [#allocation26], 4294966768  ;;  %p1128_p9 = scmp.lt.s32.totalorder %s5587_s11, 1  ;;  %s6311_s0 = sld [smem:[#allocation44_spill]]  ;;  %4387 = vmatprep.subr.bf16.mxu0 %v5408_v10  ;;  %4393 = vmatprep.subr.bf16.mxu1 %v5408_v10  ;;  %v3979_v30 = vld [vmem:[#allocation2] ss:$0 sm:$0xff] }
 0x1d9   : > { %s6312_s1 = sld [smem:[#allocation45_spill]]  ;;  %4160 = vmatprep.mubr.msk.f32.mxu0 %vm5409_vm1, %v5410_v18  ;;  %4171 = vmatprep.mubr.msk.f32.mxu1 %vm5409_vm1, %v5410_v18  ;;  %s6313_s10 = sld [smem:[#allocation42_spill]]  ;;  %vm1505_vm2 = vcmask 1043456   ;;  %vm1507_vm3 = vcmask 64512   ;;  %vm2161_vm5 = vcmask 1046528   ;;  %vm2185_vm6 = vcmask 97280  }
 0x1da   : > { %s6326_s11 = smov (!%p1128_p9, %s5587_s11), 1  ;;  %s6314_s23 = sld [smem:[#allocation39_spill]]  ;;  %vm5922_vm4 = vmpackc.low %vm1507_vm3, %vm1507_vm3  ;;  %vm2190_vm7 = vcmask 105472  }
 0x1db   : > { %s3975_s4 = sshll.u32 %s6326_s11, 3  ;;  %s6315_s18 = sld [smem:[#allocation38_spill]] }
 0x1dc   : > { %s3976_s2 = sshll.u32 %s6326_s11, 2  ;;  %s6316_s16 = sld [smem:[#allocation41_spill]] }
 0x1dd   : > { %s5868_s6 = scalar_lea.vmem %s6309_s15, %s3975_s4  ;;  %v1173_v7 = vld [vmem:[%s6310_s22] sm:$0xff]  ;;  %v1174_v8 = vld [vmem:[%s6310_s22 + $0x8] sm:$0xff]  ;;  %v1175_v13 = vld [vmem:[%s6310_s22 + $0x10] sm:$0xff]  ;;  %s6317_s26 = sld [smem:[#allocation40_spill]] }
 0x1de   : > { %v5871_v0 = vld [vmem:[%s5868_s6] sm:$0xff]  ;;  %v4388_v11 = vpack.c.bf16 %v1174_v8, %v1173_v7  ;;  %v1251_v12 = vld [vmem:[%s6311_s0 + $0x8] sm:$0xff]  ;;  %v1176_v14 = vld [vmem:[%s6310_s22 + $0x18] sm:$0xff]  ;;  %s5411_s15 = smov 120  }
 0x1df   : > { %v1143_v1 = vsel %vm1142_vm0, %v5871_v0, 0.0  ;;  %v1250_v9 = vld [vmem:[%s6311_s0] sm:$0xff]  ;;  %v1252_v16 = vld [vmem:[%s6311_s0 + $0x10] sm:$0xff]  ;;  %v1253_v17 = vld [vmem:[%s6311_s0 + $0x18] sm:$0xff]  ;;  %v4391_v20 = vpack.c.bf16 %v1176_v14, %v1175_v13 }
 0x1e0   : > { %1144 = vadd.xlane.f32.xlu0 %v1143_v1  ;;  %v4394_v15 = vpack.c.bf16 %v1251_v12, %v1250_v9  ;;  %v1399_v19 = vld [vmem:[%s6312_s1] sm:$0xff]  ;;  %4389 = vmatpush3.bf16.msra.mxu0 %v4388_v11  ;;  %v1400_v21 = vld [vmem:[%s6312_s1 + $0x8] sm:$0xff]  ;;  %v4397_v22 = vpack.c.bf16 %v1253_v17, %v1252_v16  ;;  %v1401_v31 = vld [vmem:[%s6312_s1 + $0x10] sm:$0xff] }
 0x1e1   : > { %4390 = vmatprep.subr.bf16.mxu0 %v5408_v10  ;;  %v4405_v23 = vpack.c.bf16 %v1400_v21, %v1399_v19  ;;  %v3978_v28 = vld [vmem:[%s6313_s10] ss:$0 sm:$0xff]  ;;  %v1402_v32 = vld [vmem:[%s6312_s1 + $0x18] sm:$0xff]  ;;  %s1135_s28 = scalar_lea.vmem %s6315_s18, %s3976_s2  ;;  %v1398_v38 = vld [vmem:[%s6314_s23 + $0x8] sm:$0xf]  ;;  %s5412_s10 = smov 112  }
 0x1e2   : > { %4395 = vmatpush3.bf16.msra.mxu1 %v4394_v15  ;;  %v4409_v35 = vpack.c.bf16 %v1402_v32, %v1401_v31  ;;  %v1397_v36 = vld [vmem:[%s6314_s23] sm:$0xff]  ;;  %s5413_s18 = smov 104   ;;  %s5414_s2 = smov 13   ;;  %v2195_v32 = vlaneseq }
 0x1e3   : > { %4396 = vmatprep.subr.bf16.mxu1 %v5408_v10  ;;  %v1141_v37 = vld [vmem:[%s1135_s28] sm:$0xf]  ;;  %s5416_s28 = smov 88  }
 0x1e4   : > { %4392 = vmatpush3.bf16.msra.mxu0 %v4391_v20  ;;  %v3986_v39 = vld [vmem:[%s6316_s16] ss:$0 sm:$0xff]  ;;  %s5415_s16 = smov 127  }
 0x1e5   : > { %4399 = vmatprep.subr.bf16.mxu0 %v5408_v10  ;;  %v3985_v53 = vld [vmem:[%s6317_s26] ss:$0 sm:$0xff]  ;;  %s5417_s26 = smov 96  }
 0x1e6   : > { %4398 = vmatpush3.bf16.msra.mxu1 %v4397_v22 }
 0x1e7   : > { %4406 = vmatprep.subr.bf16.mxu1 %v4405_v23 }
 0x26d   : > { %v1145_v2 = vpop.xlane.xlu0 %1144 }
 0x26e   : > { %v1147_v3 = vmul.f32 0.03125, %v1145_v2 }
 0x270   : > { %v1148_v4 = vsub.f32 %v5871_v0, %v1147_v3 }
 0x272   : > { %v1149_v5 = vmul.f32 %v1148_v4, %v1148_v4 }
 0x274   : > { %v1150_v6 = vsel %vm1142_vm0, %v1149_v5, 0.0 }
 0x275   : > { %1151 = vadd.xlane.f32.xlu0 %v1150_v6 }
 0x302   : > { %v1152_v24 = vpop.xlane.xlu0 %1151 }
 0x303   : > { %v1153_v25 = vmul.f32 0.03125, %v1152_v24 }
 0x305   : > { %v1154_v26 = vadd.f32 1e-05, %v1153_v25 }
 0x307   : > { %4799 = vrsqrt.f32 %v1154_v26 }
 0x311   : > { %v4800_v27 = vpop.eup %4799 }
 0x312   : > { %v1156_v29 = vmul.f32 %v4800_v27, %v1148_v4 }
 0x314   : > { %v1164_v33 = vmul.f32 %v3978_v28, %v1156_v29 }
 0x316   : > { %v1172_v34 = vadd.f32 %v3979_v30, %v1164_v33  ;;  %v2196_v33 = vshrl.u32 %v2195_v32, 7 }
 0x318   : > { %4161 = vmatmul.mubr.msk.f32.vlgmr.msra.gmra.mrb[0].mxu0 %vm1142_vm0, %v1172_v34  ;;  %4172 = vmatmul.mubr.msk.f32.vlgmr.msra.gmra.mrb[0].mxu1 %vm1142_vm0, %v1172_v34  ;;  %v5973_v34 = vand.u32 7, %v2196_v33 }
 0x319   : > { %4401 = vmatpush3.bf16.msra.mxu0 %v4394_v15  ;;  %4408 = vmatpush3.bf16.msra.mxu1 %v4405_v23 }
 0x31a   : > { %4402 = vmatprep.subr.bf16.mxu0 %v5408_v10  ;;  %4410 = vmatprep.subr.bf16.mxu1 %v4409_v35  ;;  %vm2248_vm8 = vcmp.eq.s32.totalorder %v5973_v34, 0  ;;  %vm2256_vm12 = vcmp.eq.s32.totalorder %v5973_v34, 1 }
 0x31b   : > { %4182 = vmatprep.mubr.msk.f32.mxu0 %vm5409_vm1, %v5410_v18  ;;  %4193 = vmatprep.mubr.msk.f32.mxu1 %vm1142_vm0, %v1397_v36 }
 0x31d   : > { %4404 = vmatpush3.bf16.msra.mxu0 %v4397_v22  ;;  %4412 = vmatpush3.bf16.msra.mxu1 %v4409_v35  ;;  %v2197_v35 = vadd.s32 8, %v2196_v33 }
 0x31e   : > { %4413 = vmatprep.subr.bf16.mxu0 %v5408_v10  ;;  %4417 = vmatprep.subr.bf16.mxu1 %v5408_v10 }
 0x320   : > { %4183 = vmatmul.mubr.msk.f32.vlgmr.msra.gmra.mrb[2].mxu0 %vm1142_vm0, %v1141_v37  ;;  %4194 = vmatmul.mubr.msk.f32.vlgmr.msra.gmra.mrb[2].mxu1 %vm1142_vm0, %v1398_v38 }
 0x321   : > { %4200 = vmatprep.mubr.msk.f32.mxu0 %vm5409_vm1, %v5410_v18  ;;  %4207 = vmatprep.mubr.msk.f32.mxu1 %vm5409_vm1, %v5410_v18 }
 0x3eb   : > { %v1246_v40 = vpop.f32.mrb[0].mxu0  ;;  %v1320_v41 = vpop.f32.mrb[0].mxu1 }
 0x3ec   : > { %v1500_v42 = vadd.f32 %v3986_v39, %v1246_v40  ;;  %v4162_v43 = vpop.f32.mrb[1].mxu0  ;;  %v4173_v44 = vpop.f32.mrb[1].mxu1  ;;  %v1503_v46 = vrot.slane %v1320_v41, 4  ;;  %v1491_v58 = vadd.f32 %v3985_v53, %v1246_v40  ;;  %v5982_v40 = vand.u32 7, %v2197_v35 }
 0x3ed   : > { %v2199_v41 = vadd.s32 24, %v2196_v33 }
 0x3ee   : > { %v1501_v45 = vmul.f32 0.35355338, %v1500_v42  ;;  %v5937_v59 = vmul.f32 0.35355338, %v1491_v58  ;;  %vm2249_vm9 = vcmp.eq.s32.totalorder %v5982_v40, 0  ;;  %v2198_v42 = vadd.s32 16, %v2196_v33 }
 0x3ef   : > { %vm2257_vm13 = vcmp.eq.s32.totalorder %v5982_v40, 1 }
 0x3f0   : > { %1747 = vrot.lane.b32.xlu0 %v1501_v45, %s5411_s15 }
 0x3f3   : > { %v1393_v47 = vpop.f32.mrb[2].mxu0  ;;  %v4195_v48 = vpop.f32.mrb[2].mxu1 }
 0x3f4   : > { %v1506_v49 = vsel %vm1505_vm2, %v1393_v47, %v1503_v46  ;;  %v1475_v50 = vpop.f32.mrb[3].mxu1  ;;  %v4184_v52 = vpop.f32.mrb[3].mxu0  ;;  %v5991_v47 = vand.u32 7, %v2199_v41 }
 0x3f5   : > { %v4418_v54 = vpack.c.bf16 %v4195_v48, %v1475_v50  ;;  %v4749_v55 = vpack.i.bf16 %v4195_v48, %v1475_v50  ;;  %v4414_v56 = vpack.c.bf16 %v1503_v46, %v1506_v49  ;;  %v5927_v57 = vpack.i.bf16 %v1503_v46, %v1506_v49 }
 0x3f6   : > { %v5993_v48 = vand.u32 7, %v2198_v42  ;;  %vm2251_vm10 = vcmp.eq.s32.totalorder %v5991_v47, 0  ;;  %vm2259_vm14 = vcmp.eq.s32.totalorder %v5991_v47, 1 }
 0x3f7   : > { %4750 = vrot.lane.b32.xlu1 %v4749_v55, %s5411_s15  ;;  %4416 = vmatpush3.bf16.xpose.msk.msra.mxu0 %vm5922_vm4, %v4414_v56 }
 0x3f8   : > { %4420 = vmatpush3.bf16.xpose.msk.msra.mxu1 %vm5922_vm4, %v4418_v54  ;;  %4421 = vmatprep.subr.bf16.mxu0 %v5408_v10  ;;  %vm2250_vm11 = vcmp.eq.s32.totalorder %v5993_v48, 0  ;;  %vm2258_vm15 = vcmp.eq.s32.totalorder %v5993_v48, 1 }
 0x3f9   : > { %4425 = vmatprep.subr.bf16.mxu1 %v5408_v10 }
 0x3fb   : > { %4755 = vrot.lane.b32.xlu1 %v4749_v55, %s5412_s10 }
 0x3fe   : > { %4201 = vmatmul.mubr.msk.f32.vlgmr.msra.gmra.mrb[4].mxu0 %vm1507_vm3, %v5937_v59 }
 0x3ff   : > { %4208 = vmatmul.mubr.msk.f32.vlgmr.msra.gmra.mrb[4].mxu1 %vm1507_vm3, %v1501_v45  ;;  %4760 = vrot.lane.b32.xlu1 %v4749_v55, %s5413_s18 }
 0x400   : > { %4221 = vmatprep.mubr.msk.f32.mxu1 %vm5409_vm1, %v5410_v18  ;;  %4214 = vmatprep.mubr.msk.f32.mxu0 %vm5409_vm1, %v5410_v18 }
 0x403   : > { %1911 = vrot.lane.b32.xlu1 %v1501_v45, %s5412_s10 }
 0x407   : > { %2075 = vrot.lane.b32.xlu1 %v1501_v45, %s5413_s18 }
 0x462   : > { %v1748_v4 = vpop.permute.xlu0 %1747 }
 0x469   : > { %v4751_v60 = vpop.permute.xlu1 %4750 }
 0x46a   : > { %v4753_v61 = vunpack.i.h.bf16 %v4751_v60  ;;  %v4752_v62 = vunpack.i.l.bf16 %v4751_v60 }
 0x46c   : > { %v4426_v63 = vpack.c.bf16 %v4753_v61, %v4752_v62 }
 0x46d   : > { %v4756_v1 = vpop.permute.xlu1 %4755 }
 0x46e   : > { %4428 = vmatpush3.bf16.xpose.msk.msra.mxu1 %vm5922_vm4, %v4426_v63  ;;  %v4758_v2 = vunpack.i.h.bf16 %v4756_v1  ;;  %v4757_v3 = vunpack.i.l.bf16 %v4756_v1 }
 0x46f   : > { %4433 = vmatprep.subr.bf16.mxu1 %v5408_v10 }
 0x470   : > { %v4434_v5 = vpack.c.bf16 %v4758_v2, %v4757_v3 }
 0x471   : > { %v4761_v6 = vpop.permute.xlu1 %4760 }
 0x472   : > { %v4763_v7 = vunpack.i.h.bf16 %v4761_v6  ;;  %v4762_v8 = vunpack.i.l.bf16 %v4761_v6 }
 0x474   : > { %v4442_v9 = vpack.c.bf16 %v4763_v7, %v4762_v8 }
 0x475   : > { %4222 = vmatmul.mubr.msk.f32.vlgmr.msra.gmra.mrb[6].mxu1 %vm1507_vm3, %v1748_v4  ;;  %v1912_v11 = vpop.permute.xlu1 %1911 }
 0x476   : > { %4436 = vmatpush3.bf16.xpose.msk.msra.mxu1 %vm5922_vm4, %v4434_v5  ;;  %4235 = vmatprep.mubr.msk.f32.mxu1 %vm5409_vm1, %v5410_v18 }
 0x477   : > { %4441 = vmatprep.subr.bf16.mxu1 %v5408_v10 }
 0x479   : > { %v2076_v12 = vpop.permute.xlu1 %2075 }
 0x47d   : > { %4236 = vmatmul.mubr.msk.f32.vlgmr.msra.gmra.mrb[8].mxu1 %vm1507_vm3, %v1912_v11 }
 0x47e   : > { %4444 = vmatpush3.bf16.xpose.msk.msra.mxu1 %vm5922_vm4, %v4442_v9  ;;  %4249 = vmatprep.mubr.msk.f32.mxu1 %vm5409_vm1, %v5410_v18 }
 0x47f   : > { %4449 = vmatprep.subr.bf16.mxu1 %v5408_v10 }
 0x485   : > { %4250 = vmatmul.mubr.msk.f32.vlgmr.msra.gmra.mrb[10].mxu1 %vm1507_vm3, %v2076_v12 }
 0x486   : > { %4263 = vmatprep.mubr.msk.f32.mxu1 %vm5409_vm1, %v5410_v18 }
 0x4d1   : > { %v5967_v13 = vpop.f32.mrb[4].mxu0 }
 0x4d2   : > { %v1661_v14 = vpop.f32.mrb[4].mxu1  ;;  %v4202_v15 = vpop.f32.mrb[5].mxu0 }
 0x4d3   : > { %v4209_v16 = vpop.f32.mrb[5].mxu1  ;;  %v2162_v19 = vrot.slane %v1661_v14, 1  ;;  %v2186_v36 = vsel %vm2185_vm6, %v1661_v14, 0.0 }
 0x548   : > { %v1825_v17 = vpop.f32.mrb[6].mxu1 }
 0x549   : > { %v2163_v20 = vrot.slane %v1825_v17, 1  ;;  %v4223_v21 = vpop.f32.mrb[7].mxu1  ;;  %v2187_v43 = vsel %vm2185_vm6, %v1825_v17, 0.0 }
 0x54b   : > { %v2164_v22 = vsel %vm2161_vm5, %v2162_v19, %v2163_v20 }
 0x54c   : > { %2173 = vrot.lane.b32.xlu1 %v2164_v22, %s5414_s2 }
 0x550   : > { %v1989_v23 = vpop.f32.mrb[8].mxu1 }
 0x551   : > { %v2165_v24 = vrot.slane %v1989_v23, 1  ;;  %v4237_v25 = vpop.f32.mrb[9].mxu1  ;;  %v2188_v49 = vsel %vm2185_vm6, %v1989_v23, 0.0 }
 0x553   : > { %v2166_v26 = vsel %vm2161_vm5, %v2163_v20, %v2165_v24 }
 0x554   : > { %2175 = vrot.lane.b32.xlu1 %v2166_v26, %s5414_s2 }
 0x558   : > { %v2153_v27 = vpop.f32.mrb[10].mxu1 }
 0x559   : > { %v2167_v28 = vrot.slane %v2153_v27, 1  ;;  %v4251_v29 = vpop.f32.mrb[11].mxu1  ;;  %v2189_v50 = vsel %vm2185_vm6, %v2153_v27, 0.0 }
 0x55b   : > { %v2171_v30 = vsel %vm2161_vm5, %v2167_v28, %v2162_v19  ;;  %v2168_v31 = vsel %vm2161_vm5, %v2165_v24, %v2167_v28  ;;  %vm2280_vm5 = vcmp.eq.s32.totalorder %v5973_v34, 2 }
 0x55c   : > { %2179 = vrot.lane.b32.xlu0 %v2171_v30, %s5414_s2  ;;  %2177 = vrot.lane.b32.xlu1 %v2168_v31, %s5414_s2  ;;  %s5421_s2 = smov 8  }
 0x5be   : > { %v2174_v37 = vpop.permute.xlu1 %2173 }
 0x5bf   : > { %v5978_v38 = vsel %vm2190_vm7, %v2186_v36, %v2174_v37 }
 0x5c0   : > { %v2252_v39 = vsel %vm2248_vm8, %v5978_v38, 0.0  ;;  %vm2282_vm8 = vcmp.eq.s32.totalorder %v5993_v48, 2 }
 0x5c1   : > { %2264 = vrot.lane.b32.xlu1 %v2252_v39, %s5415_s16 }
 0x5c6   : > { %v2176_v44 = vpop.permute.xlu1 %2175 }
 0x5c7   : > { %v5987_v45 = vsel %vm2190_vm7, %v2187_v43, %v2176_v44 }
 0x5c8   : > { %v2253_v46 = vsel %vm2249_vm9, %v5987_v45, 0.0  ;;  %vm2283_vm9 = vcmp.eq.s32.totalorder %v5991_v47, 2 }
 0x5c9   : > { %2266 = vrot.lane.b32.xlu0 %v2253_v46, %s5415_s16 }
 0x5ce   : > { %v2180_v52 = vpop.permute.xlu0 %2179  ;;  %v2178_v53 = vpop.permute.xlu1 %2177 }
 0x5cf   : > { %v6000_v54 = vsel %vm2190_vm7, %v2189_v50, %v2180_v52  ;;  %v6003_v55 = vsel %vm2190_vm7, %v2188_v49, %v2178_v53  ;;  %vm2281_vm7 = vcmp.eq.s32.totalorder %v5982_v40, 2 }
 0x5d0   : > { %v2255_v56 = vsel %vm2251_vm10, %v6000_v54, 0.0  ;;  %v2254_v58 = vsel %vm2250_vm11, %v6003_v55, 0.0  ;;  %vm2304_vm10 = vcmp.eq.s32.totalorder %v5973_v34, 3  ;;  %vm2305_vm11 = vcmp.eq.s32.totalorder %v5982_v40, 3 }
 0x5d1   : > { %2270 = vrot.lane.b32.xlu0 %v2255_v56, %s5415_s16  ;;  %2268 = vrot.lane.b32.xlu1 %v2254_v58, %s5415_s16 }
 0x633   : > { %v2265_v60 = vpop.permute.xlu1 %2264 }
 0x634   : > { %v2276_v61 = vsel %vm2256_vm12, %v5978_v38, %v2265_v60  ;;  %vm2306_vm12 = vcmp.eq.s32.totalorder %v5993_v48, 3 }
 0x635   : > { %2288 = vrot.lane.b32.xlu1 %v2276_v61, %s5415_s16 }
 0x63b   : > { %v2267_v62 = vpop.permute.xlu0 %2266 }
 0x63c   : > { %v2277_v63 = vsel %vm2257_vm13, %v5987_v45, %v2267_v62  ;;  %vm2307_vm13 = vcmp.eq.s32.totalorder %v5991_v47, 3 }
 0x63d   : > { %2290 = vrot.lane.b32.xlu0 %v2277_v63, %s5415_s16 }
 0x643   : > { %v2271_v1 = vpop.permute.xlu0 %2270  ;;  %v2269_v2 = vpop.permute.xlu1 %2268 }
 0x644   : > { %v2279_v3 = vsel %vm2259_vm14, %v6000_v54, %v2271_v1  ;;  %v2278_v4 = vsel %vm2258_vm15, %v6003_v55, %v2269_v2  ;;  %vm2328_vm14 = vcmp.eq.s32.totalorder %v5973_v34, 4  ;;  %vm2330_vm15 = vcmp.eq.s32.totalorder %v5993_v48, 4 }
 0x645   : > { %2294 = vrot.lane.b32.xlu0 %v2279_v3, %s5415_s16  ;;  %2292 = vrot.lane.b32.xlu1 %v2278_v4, %s5415_s16 }
 0x6a7   : > { %v2289_v5 = vpop.permute.xlu1 %2288 }
 0x6a8   : > { %v2300_v6 = vsel %vm2280_vm5, %v5978_v38, %v2289_v5  ;;  %vm2331_vm5 = vcmp.eq.s32.totalorder %v5991_v47, 4 }
 0x6a9   : > { %2312 = vrot.lane.b32.xlu1 %v2300_v6, %s5415_s16 }
 0x6af   : > { %v2291_v7 = vpop.permute.xlu0 %2290 }
 0x6b0   : > { %v2301_v8 = vsel %vm2281_vm7, %v5987_v45, %v2291_v7  ;;  %vm2352_vm7 = vcmp.eq.s32.totalorder %v5973_v34, 5 }
 0x6b1   : > { %2314 = vrot.lane.b32.xlu0 %v2301_v8, %s5415_s16 }
 0x6b5   : > { %4765 = vrot.lane.b32.xlu0 %v5927_v57, %s5411_s15 }
 0x6b7   : > { %v2293_v9 = vpop.permute.xlu1 %2292  ;;  %v2295_v12 = vpop.permute.xlu0 %2294 }
 0x6b8   : > { %v2302_v11 = vsel %vm2282_vm8, %v6003_v55, %v2293_v9  ;;  %v2303_v14 = vsel %vm2283_vm9, %v6000_v54, %v2295_v12  ;;  %vm2353_vm8 = vcmp.eq.s32.totalorder %v5982_v40, 5  ;;  %vm2354_vm9 = vcmp.eq.s32.totalorder %v5993_v48, 5 }
 0x6b9   : > { %2316 = vrot.lane.b32.xlu1 %v2302_v11, %s5415_s16  ;;  %4770 = vrot.lane.b32.xlu0 %v5927_v57, %s5412_s10 }
 0x6bd   : > { %2318 = vrot.lane.b32.xlu1 %v2303_v14, %s5415_s16  ;;  %4775 = vrot.lane.b32.xlu0 %v5927_v57, %s5413_s18 }
 0x6c1   : > { %1665 = vrot.lane.b32.xlu1 %v5937_v59, %s5411_s15  ;;  %1993 = vrot.lane.b32.xlu0 %v5937_v59, %s5413_s18  ;;  %s5419_s15 = smov 80   ;;  %s6322_s18 = sld [smem:[#allocation46_spill]] }
 0x6c5   : > { %1829 = vrot.lane.b32.xlu1 %v5937_v59, %s5412_s10  ;;  %s5420_s10 = smov 72  }
 0x71b   : > { %v2313_v15 = vpop.permute.xlu1 %2312 }
 0x71c   : > { %v2324_v16 = vsel %vm2304_vm10, %v5978_v38, %v2313_v15  ;;  %vm2355_vm10 = vcmp.eq.s32.totalorder %v5991_v47, 5 }
 0x71d   : > { %2336 = vrot.lane.b32.xlu1 %v2324_v16, %s5415_s16 }
 0x723   : > { %v2315_v17 = vpop.permute.xlu0 %2314 }
 0x724   : > { %v2325_v19 = vsel %vm2305_vm11, %v5987_v45, %v2315_v17  ;;  %vm2376_vm11 = vcmp.eq.s32.totalorder %v5973_v34, 6 }
 0x725   : > { %2338 = vrot.lane.b32.xlu0 %v2325_v19, %s5415_s16 }
 0x727   : > { %v4766_v20 = vpop.permute.xlu0 %4765 }
 0x728   : > { %v4768_v21 = vunpack.i.h.bf16 %v4766_v20  ;;  %v4767_v22 = vunpack.i.l.bf16 %v4766_v20 }
 0x72a   : > { %v4422_v59 = vpack.c.bf16 %v4768_v21, %v4767_v22 }
 0x72b   : > { %v2317_v23 = vpop.permute.xlu1 %2316  ;;  %v4771_v24 = vpop.permute.xlu0 %4770 }
 0x72c   : > { %4424 = vmatpush3.bf16.xpose.msk.msra.mxu0 %vm5922_vm4, %v4422_v59  ;;  %v2326_v25 = vsel %vm2306_vm12, %v6003_v55, %v2317_v23  ;;  %v4773_v26 = vunpack.i.h.bf16 %v4771_v24  ;;  %v4772_v27 = vunpack.i.l.bf16 %v4771_v24  ;;  %vm2377_vm12 = vcmp.eq.s32.totalorder %v5982_v40, 6 }
 0x72d   : > { %2340 = vrot.lane.b32.xlu1 %v2326_v25, %s5415_s16  ;;  %4429 = vmatprep.subr.bf16.mxu0 %v5408_v10 }
 0x72e   : > { %v4430_v30 = vpack.c.bf16 %v4773_v26, %v4772_v27 }
 0x72f   : > { %v2319_v28 = vpop.permute.xlu1 %2318  ;;  %v4776_v32 = vpop.permute.xlu0 %4775 }
 0x730   : > { %v2327_v29 = vsel %vm2307_vm13, %v6000_v54, %v2319_v28  ;;  %v4778_v33 = vunpack.i.h.bf16 %v4776_v32  ;;  %v4777_v35 = vunpack.i.l.bf16 %v4776_v32  ;;  %vm2378_vm13 = vcmp.eq.s32.totalorder %v5993_v48, 6 }
 0x731   : > { %2342 = vrot.lane.b32.xlu0 %v2327_v29, %s5415_s16 }
 0x732   : > { %v4438_v36 = vpack.c.bf16 %v4778_v33, %v4777_v35 }
 0x733   : > { %v1666_v31 = vpop.permute.xlu1 %1665  ;;  %v1994_v39 = vpop.permute.xlu0 %1993 }
 0x734   : > { %4215 = vmatmul.mubr.msk.f32.vlgmr.msra.gmra.mrb[6].mxu0 %vm1507_vm3, %v1666_v31 }
 0x735   : > { %4432 = vmatpush3.bf16.xpose.msk.msra.mxu0 %vm5922_vm4, %v4430_v30  ;;  %4228 = vmatprep.mubr.msk.f32.mxu0 %vm5409_vm1, %v5410_v18 }
 0x736   : > { %4437 = vmatprep.subr.bf16.mxu0 %v5408_v10 }
 0x737   : > { %v1830_v37 = vpop.permute.xlu1 %1829 }
 0x73c   : > { %4229 = vmatmul.mubr.msk.f32.vlgmr.msra.gmra.mrb[8].mxu0 %vm1507_vm3, %v1830_v37 }
 0x73d   : > { %4440 = vmatpush3.bf16.xpose.msk.msra.mxu0 %vm5922_vm4, %v4438_v36  ;;  %4242 = vmatprep.mubr.msk.f32.mxu0 %vm5409_vm1, %v5410_v18  ;;  %vm2329_vm4 = vcmp.eq.s32.totalorder %v5982_v40, 4 }
 0x73e   : > { %4445 = vmatprep.subr.bf16.mxu0 %v5408_v10 }
 0x744   : > { %4243 = vmatmul.mubr.msk.f32.vlgmr.msra.gmra.mrb[10].mxu0 %vm1507_vm3, %v1994_v39 }
 0x745   : > { %4256 = vmatprep.mubr.msk.f32.mxu0 %vm5409_vm1, %v5410_v18 }
 0x78f   : > { %v2337_v41 = vpop.permute.xlu1 %2336 }
 0x790   : > { %v2348_v42 = vsel %vm2328_vm14, %v5978_v38, %v2337_v41  ;;  %vm2379_vm14 = vcmp.eq.s32.totalorder %v5991_v47, 6 }
 0x791   : > { %2360 = vrot.lane.b32.xlu1 %v2348_v42, %s5415_s16 }
 0x797   : > { %v2339_v51 = vpop.permute.xlu0 %2338 }
 0x798   : > { %v2349_v43 = vsel %vm2329_vm4, %v5987_v45, %v2339_v51  ;;  %vm2400_vm4 = vcmp.eq.s32.totalorder %v5973_v34, 7  ;;  %v2972_v51 = vld [vmem:[#allocation7 + $0x10] sm:$0xff] }
 0x799   : > { %2362 = vrot.lane.b32.xlu0 %v2349_v43, %s5415_s16 }
 0x79f   : > { %v2341_v44 = vpop.permute.xlu1 %2340 }
 0x7a0   : > { %v2350_v46 = vsel %vm2330_vm15, %v6003_v55, %v2341_v44  ;;  %vm2401_vm15 = vcmp.eq.s32.totalorder %v5982_v40, 7 }
 0x7a1   : > { %2364 = vrot.lane.b32.xlu1 %v2350_v46, %s5415_s16 }
 0x7a3   : > { %v2343_v49 = vpop.permute.xlu0 %2342 }
 0x7a4   : > { %v2351_v50 = vsel %vm2331_vm5, %v6000_v54, %v2343_v49  ;;  %vm2402_vm5 = vcmp.eq.s32.totalorder %v5993_v48, 7 }
 0x7a5   : > { %2366 = vrot.lane.b32.xlu0 %v2351_v50, %s5415_s16 }
 0x803   : > { %v2361_v52 = vpop.permute.xlu1 %2360 }
 0x804   : > { %v2372_v53 = vsel %vm2352_vm7, %v5978_v38, %v2361_v52  ;;  %vm2403_vm7 = vcmp.eq.s32.totalorder %v5991_v47, 7 }
 0x805   : > { %2384 = vrot.lane.b32.xlu1 %v2372_v53, %s5415_s16 }
 0x807   : > { %v1743_v56 = vpop.f32.mrb[6].mxu0 }
 0x808   : > { %v4216_v58 = vpop.f32.mrb[7].mxu0 }
 0x80b   : > { %v2363_v60 = vpop.permute.xlu0 %2362 }
 0x80c   : > { %v2373_v61 = vsel %vm2353_vm8, %v5987_v45, %v2363_v60  ;;  %vm5418_vm8 = vmmov 1  }
 0x80d   : > { %2386 = vrot.lane.b32.xlu0 %v2373_v61, %s5415_s16 }
 0x80f   : > { %v1907_v62 = vpop.f32.mrb[8].mxu0 }
 0x810   : > { %v4230_v63 = vpop.f32.mrb[9].mxu0 }
 0x813   : > { %v2365_v1 = vpop.permute.xlu1 %2364 }
 0x814   : > { %v2374_v2 = vsel %vm2354_vm9, %v6003_v55, %v2365_v1  ;;  %vm6129_vm9 = vmpackc.low %vm1505_vm2, %vm5418_vm8  ;;  %vm2805_vm2 = vcmask 130048  }
 0x815   : > { %2388 = vrot.lane.b32.xlu1 %v2374_v2, %s5415_s16 }
 0x817   : > { %v2071_v3 = vpop.f32.mrb[10].mxu0  ;;  %v2367_v4 = vpop.permute.xlu0 %2366 }
 0x818   : > { %v4244_v5 = vpop.f32.mrb[11].mxu0  ;;  %v2375_v6 = vsel %vm2355_vm10, %v6000_v54, %v2367_v4 }
 0x819   : > { %2390 = vrot.lane.b32.xlu0 %v2375_v6, %s5415_s16 }
 0x877   : > { %v2385_v7 = vpop.permute.xlu1 %2384 }
 0x878   : > { %v2396_v8 = vsel %vm2376_vm11, %v5978_v38, %v2385_v7 }
 0x879   : > { %2408 = vrot.lane.b32.xlu1 %v2396_v8, %s5415_s16 }
 0x87f   : > { %v2387_v9 = vpop.permute.xlu0 %2386 }
 0x880   : > { %v2397_v11 = vsel %vm2377_vm12, %v5987_v45, %v2387_v9 }
 0x881   : > { %2410 = vrot.lane.b32.xlu0 %v2397_v11, %s5415_s16 }
 0x887   : > { %v2389_v12 = vpop.permute.xlu1 %2388 }
 0x888   : > { %v2398_v14 = vsel %vm2378_vm13, %v6003_v55, %v2389_v12 }
 0x889   : > { %2412 = vrot.lane.b32.xlu1 %v2398_v14, %s5415_s16 }
 0x88b   : > { %v2391_v15 = vpop.permute.xlu0 %2390 }
 0x88c   : > { %v2399_v16 = vsel %vm2379_vm14, %v6000_v54, %v2391_v15 }
 0x88d   : > { %2414 = vrot.lane.b32.xlu0 %v2399_v16, %s5415_s16  ;;  %s5422_s16 = smov 16  }
 0x8eb   : > { %v2409_v17 = vpop.permute.xlu1 %2408 }
 0x8ec   : > { %v2420_v19 = vsel %vm2400_vm4, %v5978_v38, %v2409_v17 }
 0x8ed   : > { %v2424_v20 = vadd.f32 %v2420_v19, %v5967_v13 }
 0x8ef   : > { %v2428_v21 = vsel %vm2185_vm6, %v2424_v20, -inf }
 0x8f0   : > { %2429 = vmax.xlane.f32.xlu1 %v2428_v21 }
 0x8f3   : > { %v2411_v22 = vpop.permute.xlu0 %2410 }
 0x8f4   : > { %v2421_v59 = vsel %vm2401_vm15, %v5987_v45, %v2411_v22  ;;  %v2809_v22 = vld [vmem:[%s6322_s18] sm:$0xff] }
 0x8f5   : > { %v2425_v23 = vadd.f32 %v2421_v59, %v1743_v56  ;;  %v2810_v59 = vld [vmem:[%s6322_s18 + $0x8] sm:$0xff] }
 0x8f7   : > { %v2431_v24 = vsel %vm2185_vm6, %v2425_v23, -inf }
 0x8f8   : > { %2432 = vmax.xlane.f32.xlu0 %v2431_v24 }
 0x8fb   : > { %v2413_v34 = vpop.permute.xlu1 %2412 }
 0x8fc   : > { %v2422_v25 = vsel %vm2402_vm5, %v6003_v55, %v2413_v34 }
 0x8fd   : > { %v2426_v13 = vadd.f32 %v2422_v25, %v1907_v62  ;;  %v2811_v25 = vld [vmem:[%s6322_s18 + $0x10] sm:$0xff] }
 0x8ff   : > { %v2415_v38 = vpop.permute.xlu0 %2414  ;;  %v2434_v26 = vsel %vm2185_vm6, %v2426_v13, -inf }
 0x900   : > { %v2423_v40 = vsel %vm2403_vm7, %v6000_v54, %v2415_v38  ;;  %2435 = vmax.xlane.f32.xlu0 %v2434_v26 }
 0x901   : > { %v2427_v27 = vadd.f32 %v2423_v40, %v2071_v3 }
 0x903   : > { %v2437_v45 = vsel %vm2185_vm6, %v2427_v27, -inf }
 0x904   : > { %2438 = vmax.xlane.f32.xlu1 %v2437_v45  ;;  %v2887_v45 = vld [vmem:[#allocation4 + $0x8] sm:$0xff] }
 0x915   : > { %4785 = vrot.lane.b32.xlu1 %v5927_v57, %s5416_s28  ;;  %s5423_s28 = smov 24  }
 0x916   : > { %4780 = vrot.lane.b32.xlu0 %v5927_v57, %s5417_s26 }
 0x97d   : > { %v2430_v48 = vpop.xlane.xlu1 %2429 }
 0x97e   : > { %v2440_v47 = vsub.f32 %v2424_v20, %v2430_v48 }
 0x980   : > { %v2444_v55 = vmul.f32 1.442695, %v2440_v47  ;;  %v2888_v47 = vld [vmem:[#allocation4 + $0x10] sm:$0xff] }
 0x982   : > { %4801 = vpow2.f32 %v2444_v55  ;;  %v2889_v55 = vld [vmem:[#allocation4 + $0x18] sm:$0xff] }
 0x985   : > { %v2433_v28 = vpop.xlane.xlu0 %2432 }
 0x986   : > { %v2441_v29 = vsub.f32 %v2425_v23, %v2433_v28  ;;  %v4462_v23 = vpack.c.bf16 %v2810_v59, %v2809_v22  ;;  %v4471_v28 = vpack.c.bf16 %v2889_v55, %v2888_v47  ;;  %v4029_v55 = vld [vmem:[#allocation13] ss:$0 sm:$0xff] }
 0x988   : > { %v2446_v30 = vmul.f32 1.442695, %v2441_v29 }
 0x98a   : > { %4803 = vpow2.f32 %v2446_v30 }
 0x98c   : > { %v4802_v54 = vpop.eup %4801 }
 0x98d   : > { %v2436_v31 = vpop.xlane.xlu0 %2435  ;;  %v2452_v32 = vsel %vm2185_vm6, %v4802_v54, 0.0 }
 0x98e   : > { %v2442_v33 = vsub.f32 %v2426_v13, %v2436_v31  ;;  %2453 = vadd.xlane.f32.xlu0 %v2452_v32  ;;  %v2812_v13 = vld [vmem:[%s6322_s18 + $0x18] sm:$0xff] }
 0x98f   : > { %v4465_v38 = vpack.c.bf16 %v2812_v13, %v2811_v25 }
 0x990   : > { %v2448_v35 = vmul.f32 1.442695, %v2442_v33  ;;  %v2970_v33 = vld [vmem:[#allocation7] sm:$0xff] }
 0x991   : > { %v4781_v36 = vpop.permute.xlu0 %4780  ;;  %v2439_v37 = vpop.xlane.xlu1 %2438 }
 0x992   : > { %4805 = vpow2.f32 %v2448_v35  ;;  %v4783_v39 = vunpack.i.h.bf16 %v4781_v36  ;;  %v4782_v41 = vunpack.i.l.bf16 %v4781_v36  ;;  %v2443_v42 = vsub.f32 %v2427_v27, %v2439_v37  ;;  %v2886_v27 = vld [vmem:[#allocation4] sm:$0xff]  ;;  %v2971_v35 = vld [vmem:[#allocation7 + $0x8] sm:$0xff] }
 0x993   : > { %v4468_v48 = vpack.c.bf16 %v2887_v45, %v2886_v27 }
 0x994   : > { %v4804_v43 = vpop.eup %4803  ;;  %v4446_v44 = vpack.c.bf16 %v4783_v39, %v4782_v41  ;;  %v2450_v46 = vmul.f32 1.442695, %v2443_v42  ;;  %v4474_v41 = vpack.c.bf16 %v2971_v35, %v2970_v33  ;;  %v4030_v33 = vld [vmem:[#allocation15] ss:$0 sm:$0xff]  ;;  %v3214_v35 = vld [vmem:[#allocation16] sm:$0xff] }
 0x995   : > { %v4786_v49 = vpop.permute.xlu1 %4785  ;;  %v2455_v50 = vsel %vm2185_vm6, %v4804_v43, 0.0 }
 0x996   : > { %4807 = vpow2.f32 %v2450_v46  ;;  %v4788_v52 = vunpack.i.h.bf16 %v4786_v49  ;;  %v4787_v53 = vunpack.i.l.bf16 %v4786_v49  ;;  %4448 = vmatpush3.bf16.msk.msra.mxu0 %vm6129_vm9, %v4446_v44  ;;  %2456 = vadd.xlane.f32.xlu1 %v2455_v50 }
 0x997   : > { %4453 = vmatprep.subr.bf16.mxu0 %v5408_v10 }
 0x998   : > { %v4450_v56 = vpack.c.bf16 %v4788_v52, %v4787_v53 }
 0x99a   : > { %4452 = vmatpush3.bf16.msk.msra.mxu1 %vm6129_vm9, %v4450_v56  ;;  %v3069_v56 = vld [vmem:[#allocation10] sm:$0xff] }
 0x99b   : > { %4457 = vmatprep.subr.bf16.mxu1 %v5408_v10 }
 0x99c   : > { %v4806_v58 = vpop.eup %4805 }
 0x99d   : > { %v2458_v60 = vsel %vm2185_vm6, %v4806_v58, 0.0 }
 0x99e   : > { %2459 = vadd.xlane.f32.xlu0 %v2458_v60  ;;  %v3071_v60 = vld [vmem:[#allocation10 + $0x10] sm:$0xff] }
 0x9a0   : > { %v4808_v61 = vpop.eup %4807 }
 0x9a1   : > { %v2461_v62 = vsel %vm2185_vm6, %v4808_v61, 0.0 }
 0x9a2   : > { %2462 = vadd.xlane.f32.xlu1 %v2461_v62  ;;  %v3072_v62 = vld [vmem:[#allocation10 + $0x18] sm:$0xff] }
 0x9b3   : > { %4790 = vrot.lane.b32.xlu1 %v5927_v57, %s5419_s15  ;;  %s5424_s15 = smov 64  }
 0x9b4   : > { %4795 = vrot.lane.b32.xlu0 %v5927_v57, %s5420_s10  ;;  %s5425_s10 = smov 32  }
 0xa1b   : > { %v2454_v63 = vpop.xlane.xlu0 %2453 }
 0xa1c   : > { %4809 = vrcp.f32 %v2454_v63  ;;  %v4483_v63 = vpack.c.bf16 %v3072_v62, %v3071_v60 }
 0xa23   : > { %v2457_v1 = vpop.xlane.xlu1 %2456 }
 0xa24   : > { %4811 = vrcp.f32 %v2457_v1  ;;  %v4020_v1 = vld [vmem:[#allocation6] ss:$0 sm:$0xff] }
 0xa26   : > { %v4810_v2 = vpop.eup %4809 }
 0xa27   : > { %v2468_v3 = vmul.f32 %v4810_v2, %v4802_v54 }
 0xa29   : > { %4257 = vmatmul.mubr.msk.f32.vlgmr.msra.gmra.mrb[12].mxu0 %vm2185_vm6, %v2468_v3 }
 0xa2a   : > { %4270 = vmatprep.mubr.msk.f32.mxu0 %vm5409_vm1, %v5410_v18 }
 0xa2b   : > { %v2460_v4 = vpop.xlane.xlu0 %2459 }
 0xa2c   : > { %4813 = vrcp.f32 %v2460_v4 }
 0xa2e   : > { %v4812_v5 = vpop.eup %4811 }
 0xa2f   : > { %v2469_v6 = vmul.f32 %v4812_v5, %v4804_v43  ;;  %v4796_v7 = vpop.permute.xlu0 %4795  ;;  %v2463_v8 = vpop.xlane.xlu1 %2462  ;;  %v2973_v43 = vld [vmem:[#allocation7 + $0x18] sm:$0xff] }
 0xa30   : > { %v4798_v9 = vunpack.i.h.bf16 %v4796_v7  ;;  %v4797_v11 = vunpack.i.l.bf16 %v4796_v7  ;;  %4815 = vrcp.f32 %v2463_v8  ;;  %v4477_v46 = vpack.c.bf16 %v2973_v43, %v2972_v51 }
 0xa31   : > { %4264 = vmatmul.mubr.msk.f32.vlgmr.msra.gmra.mrb[12].mxu1 %vm2185_vm6, %v2469_v6 }
 0xa32   : > { %v4458_v57 = vpack.c.bf16 %v4798_v9, %v4797_v11  ;;  %4277 = vmatprep.mubr.msk.f32.mxu1 %vm5409_vm1, %v5410_v18 }
 0xa33   : > { %v4791_v12 = vpop.permute.xlu1 %4790 }
 0xa34   : > { %v4793_v14 = vunpack.i.h.bf16 %v4791_v12  ;;  %v4792_v15 = vunpack.i.l.bf16 %v4791_v12  ;;  %4460 = vmatpush3.bf16.msk.msra.mxu1 %vm6129_vm9, %v4458_v57  ;;  %v4839_v57 = vld [vmem:[%s5868_s6] sm:$0xff]  ;;  %s6323_s6 = sld [smem:[#allocation49_spill]] }
 0xa35   : > { %4467 = vmatprep.subr.bf16.mxu1 %v5408_v10 }
 0xa36   : > { %v4814_v16 = vpop.eup %4813  ;;  %v4454_v17 = vpack.c.bf16 %v4793_v14, %v4792_v15  ;;  %v4028_v14 = vld [vmem:[#allocation12] ss:$0 sm:$0xff] }
 0xa37   : > { %v2470_v19 = vmul.f32 %v4814_v16, %v4806_v58  ;;  %v3070_v58 = vld [vmem:[#allocation10 + $0x8] sm:$0xff] }
 0xa38   : > { %4456 = vmatpush3.bf16.msk.msra.mxu0 %vm6129_vm9, %v4454_v17 }
 0xa39   : > { %4461 = vmatprep.subr.bf16.mxu0 %v5408_v10 }
 0xa3a   : > { %v4816_v20 = vpop.eup %4815  ;;  %v3306_v60 = vld [vmem:[%s6323_s6 + $0x28] sm:$0xff] }
 0xa3b   : > { %v2471_v21 = vmul.f32 %v4816_v20, %v4808_v61  ;;  %4271 = vmatmul.mubr.msk.f32.vlgmr.msra.gmra.mrb[14].mxu0 %vm2185_vm6, %v2470_v19  ;;  %v4480_v61 = vpack.c.bf16 %v3070_v58, %v3069_v56  ;;  %v3305_v58 = vld [vmem:[%s6323_s6 + $0x20] sm:$0xff] }
 0xa3c   : > { %4288 = vmatprep.mubr.msk.f32.mxu0 %vm5409_vm1, %v5410_v18  ;;  %4463 = vmatpush3.bf16.msra.mxu0 %v4462_v23 }
 0xa3d   : > { %4278 = vmatmul.mubr.msk.f32.vlgmr.msra.gmra.mrb[14].mxu1 %vm2185_vm6, %v2471_v21  ;;  %4464 = vmatprep.subr.bf16.mxu0 %v5408_v10  ;;  %vm2807_vm6 = vcmask 195584  }
 0xa3e   : > { %4299 = vmatprep.mubr.msk.f32.mxu1 %vm5409_vm1, %v5410_v18  ;;  %4469 = vmatpush3.bf16.msra.mxu1 %v4468_v48 }
 0xa3f   : > { %4470 = vmatprep.subr.bf16.mxu1 %v5408_v10 }
 0xa40   : > { %4466 = vmatpush3.bf16.msra.mxu0 %v4465_v38 }
 0xa41   : > { %4473 = vmatprep.subr.bf16.mxu0 %v5408_v10 }
 0xa42   : > { %4472 = vmatpush3.bf16.msra.mxu1 %v4471_v28 }
 0xa43   : > { %4479 = vmatprep.subr.bf16.mxu1 %v5408_v10 }
 0xafc   : > { %v2548_v24 = vpop.f32.mrb[12].mxu0 }
 0xafd   : > { %v4258_v34 = vpop.f32.mrb[13].mxu0 }
 0xb04   : > { %v2628_v26 = vpop.f32.mrb[12].mxu1 }
 0xb05   : > { %2793 = vrot.lane.b32.xlu1 %v2628_v26, %s5421_s2  ;;  %v4265_v40 = vpop.f32.mrb[13].mxu1  ;;  %s6324_s2 = sld [smem:[#allocation50_spill]] }
 0xb0e   : > { %v2708_v29 = vpop.f32.mrb[14].mxu0 }
 0xb0f   : > { %2797 = vrot.lane.b32.xlu0 %v2708_v29, %s5422_s16  ;;  %v4272_v30 = vpop.f32.mrb[15].mxu0  ;;  %s1139_s16 = scalar_lea.vmem %s5579_s5, %s3975_s4 }
 0xb10   : > { %v2788_v54 = vpop.f32.mrb[14].mxu1 }
 0xb11   : > { %2801 = vrot.lane.b32.xlu1 %v2788_v54, %s5423_s28  ;;  %v4279_v31 = vpop.f32.mrb[15].mxu1 }
 0xb15   : > { %3157 = vrot.lane.b32.xlu1 %v4028_v14, %s5424_s15 }
 0xb77   : > { %v2794_v32 = vpop.permute.xlu1 %2793 }
 0xb78   : > { %v2804_v36 = vsel %vm1507_vm3, %v2548_v24, %v2794_v32  ;;  %vm3316_vm3 = vcmask 523264  }
 0xb81   : > { %v2798_v37 = vpop.permute.xlu0 %2797 }
 0xb82   : > { %v2806_v39 = vsel %vm2805_vm2, %v2804_v36, %v2798_v37  ;;  %v3215_v36 = vld [vmem:[#allocation16 + $0x8] sm:$0xff]  ;;  %v3216_v37 = vld [vmem:[#allocation16 + $0x10] sm:$0xff] }
 0xb83   : > { %v2802_v42 = vpop.permute.xlu1 %2801 }
 0xb84   : > { %v2808_v44 = vsel %vm2807_vm6, %v2806_v39, %v2802_v42  ;;  %v4486_v39 = vpack.c.bf16 %v3215_v36, %v3214_v35 }
 0xb85   : > { %4289 = vmatmul.mubr.msk.f32.vlgmr.msra.gmra.mrb[16].mxu0 %vm1142_vm0, %v2808_v44 }
 0xb86   : > { %4475 = vmatpush3.bf16.msra.mxu0 %v4474_v41  ;;  %4310 = vmatprep.mubr.msk.f32.mxu0 %vm5409_vm1, %v5410_v18  ;;  %v3217_v41 = vld [vmem:[#allocation16 + $0x18] sm:$0xff] }
 0xb87   : > { %4476 = vmatprep.subr.bf16.mxu0 %v5408_v10  ;;  %v3158_v19 = vpop.permute.xlu1 %3157  ;;  %v4489_v42 = vpack.c.bf16 %v3217_v41, %v3216_v37 }
 0xb8a   : > { %4478 = vmatpush3.bf16.msra.mxu0 %v4477_v46  ;;  %v3301_v46 = vld [vmem:[%s6323_s6] sm:$0xff] }
 0xb8b   : > { %4485 = vmatprep.subr.bf16.mxu0 %v5408_v10 }
 0xb8d   : > { %4311 = vmatmul.mubr.msk.f32.vlgmr.msra.gmra.mrb[18].mxu0 %vm1142_vm0, %v5871_v0  ;;  %v4022_v0 = vld [vmem:[#allocation9] ss:$0 sm:$0xff] }
 0xb8e   : > { %4332 = vmatprep.mubr.msk.f32.mxu0 %vm5409_vm1, %v5410_v18  ;;  %4487 = vmatpush3.bf16.msra.mxu0 %v4486_v39 }
 0xb8f   : > { %4488 = vmatprep.subr.bf16.mxu0 %v5408_v10 }
 0xb92   : > { %4490 = vmatpush3.bf16.msra.mxu0 %v4489_v42 }
 0xb93   : > { %4503 = vmatprep.subr.bf16.mxu0 %v5408_v10 }
 0xc58   : > { %v2882_v49 = vpop.f32.mrb[16].mxu0 }
 0xc59   : > { %v4290_v50 = vpop.f32.mrb[17].mxu0  ;;  %4300 = vmatmul.mubr.msk.f32.vlgmr.msra.gmra.mrb[16].mxu1 %vm1142_vm0, %v2882_v49  ;;  %v3302_v49 = vld [vmem:[%s6323_s6 + $0x8] sm:$0xff] }
 0xc5a   : > { %4321 = vmatprep.mubr.msk.f32.mxu1 %vm5409_vm1, %v5410_v18  ;;  %4481 = vmatpush3.bf16.msra.mxu1 %v4480_v61  ;;  %v3303_v50 = vld [vmem:[%s6323_s6 + $0x10] sm:$0xff] }
 0xc5b   : > { %4482 = vmatprep.subr.bf16.mxu1 %v5408_v10 }
 0xc5e   : > { %4484 = vmatpush3.bf16.msra.mxu1 %v4483_v63 }
 0xc5f   : > { %4491 = vmatprep.subr.bf16.mxu1 %v5408_v10 }
 0xc60   : > { %v3050_v52 = vpop.f32.mrb[18].mxu0 }
 0xc61   : > { %v4312_v53 = vpop.f32.mrb[19].mxu0  ;;  %v3051_v2 = vadd.f32 %v4022_v0, %v3050_v52  ;;  %v4492_v52 = vpack.c.bf16 %v3302_v49, %v3301_v46  ;;  %v4498_v0 = vpack.c.bf16 %v3306_v60, %v3305_v58 }
 0xc62   : > { %v3304_v53 = vld [vmem:[%s6323_s6 + $0x18] sm:$0xff] }
 0xc63   : > { %v4495_v56 = vpack.c.bf16 %v3304_v53, %v3303_v50 }
 0xd2c   : > { %v2966_v3 = vpop.f32.mrb[16].mxu1 }
 0xd2d   : > { %v2967_v4 = vadd.f32 %v4020_v1, %v2966_v3  ;;  %v4301_v5 = vpop.f32.mrb[17].mxu1 }
 0xd2e   : > { %v3307_v5 = vld [vmem:[%s6323_s6 + $0x30] sm:$0xff] }
 0xd2f   : > { %v3054_v6 = vadd.f32 %v3051_v2, %v2967_v4 }
 0xd31   : > { %v4024_v7 = vmul.f32 -1.442695, %v3054_v6  ;;  %v4025_v59 = vadd.f32 -0.1, %v3054_v6  ;;  %v3308_v6 = vld [vmem:[%s6323_s6 + $0x38] sm:$0xff] }
 0xd33   : > { %4817 = vpow2.f32 %v4024_v7  ;;  %v4026_v23 = vmul.f32 -1.442695, %v4025_v59  ;;  %v4501_v7 = vpack.c.bf16 %v3308_v6, %v3307_v5  ;;  %v4033_v59 = vld [vmem:[#allocation19] ss:$0 sm:$0xff] }
 0xd3d   : > { %v4818_v8 = vpop.eup %4817 }
 0xd3e   : > { %v3058_v9 = vadd.f32 1.0, %v4818_v8  ;;  %v3390_v8 = vld [vmem:[%s6324_s2] sm:$0xff] }
 0xd40   : > { %4819 = vrcp.f32 %v3058_v9  ;;  %v3391_v9 = vld [vmem:[%s6324_s2 + $0x8] sm:$0xff] }
 0xd4a   : > { %v4820_v11 = vpop.eup %4819 }
 0xd4b   : > { %v3068_v12 = vmul.f32 %v4839_v57, %v4820_v11  ;;  %v3392_v11 = vld [vmem:[%s6324_s2 + $0x10] sm:$0xff] }
 0xd4d   : > { %4322 = vmatmul.mubr.msk.f32.vlgmr.msra.gmra.mrb[18].mxu1 %vm1142_vm0, %v3068_v12  ;;  %v3393_v12 = vld [vmem:[%s6324_s2 + $0x18] sm:$0xff] }
 0xd4e   : > { %4351 = vmatprep.mubr.msk.f32.mxu1 %vm5409_vm1, %v5410_v18  ;;  %4493 = vmatpush3.bf16.msra.mxu1 %v4492_v52  ;;  %v4507_v14 = vpack.c.bf16 %v3393_v12, %v3392_v11 }
 0xd4f   : > { %4494 = vmatprep.subr.bf16.mxu1 %v5408_v10 }
 0xd52   : > { %4496 = vmatpush3.bf16.msra.mxu1 %v4495_v56 }
 0xd53   : > { %4497 = vmatprep.subr.bf16.mxu1 %v5408_v10 }
 0xd56   : > { %4499 = vmatpush3.bf16.msra.mxu1 %v4498_v0 }
 0xd57   : > { %4500 = vmatprep.subr.bf16.mxu1 %v5408_v10 }
 0xd5a   : > { %4502 = vmatpush3.bf16.msra.mxu1 %v4501_v7 }
 0xd5b   : > { %4515 = vmatprep.subr.bf16.mxu1 %v5408_v10 }
 0xe20   : > { %v3142_v15 = vpop.f32.mrb[18].mxu1 }
 0xe21   : > { %3147 = vrot.lane.b32.xlu0 %v3142_v15, %s5424_s15  ;;  %v4323_v16 = vpop.f32.mrb[19].mxu1  ;;  %v4031_v15 = vld [vmem:[#allocation18] ss:$0 sm:$0xff] }
 0xe25   : > { %3163 = vrot.lane.b32.xlu0 %v4839_v57, %s5425_s10  ;;  %v4504_v57 = vpack.c.bf16 %v3391_v9, %v3390_v8 }
 0xe93   : > { %v3148_v17 = vpop.permute.xlu0 %3147 }
 0xe94   : > { %v3150_v20 = vadd.f32 %v3148_v17, %v2967_v4 }
 0xe96   : > { %v3160_v21 = vadd.f32 %v3158_v19, %v3150_v20 }
 0xe97   : > { %v3164_v13 = vpop.permute.xlu0 %3163 }
 0xe98   : > { %4821 = vtanh.f32 %v3160_v21  ;;  %v3474_v21 = vld [vmem:[#allocation22] sm:$0xff] }
 0xe99   : > { %4823 = vpow2.f32 %v4026_v23 }
 0xea2   : > { %v4822_v22 = vpop.eup %4821 }
 0xea3   : > { %3168 = vrot.lane.b32.xlu1 %v4822_v22, %s5417_s26  ;;  %v4824_v24 = vpop.eup %4823  ;;  %v3475_v22 = vld [vmem:[#allocation22 + $0x8] sm:$0xff] }
 0xea4   : > { %v3065_v34 = vadd.f32 1.0, %v4824_v24  ;;  %v4510_v24 = vpack.c.bf16 %v3475_v22, %v3474_v21 }
 0xea6   : > { %4825 = vrcp.f32 %v3065_v34 }
 0xeb0   : > { %v4826_v25 = vpop.eup %4825 }
 0xeb1   : > { %v3162_v38 = vsub.f32 1.0, %v4826_v25 }
 0xeb3   : > { %v3166_v40 = vmul.f32 %v3164_v13, %v3162_v38  ;;  %v3476_v13 = vld [vmem:[#allocation22 + $0x10] sm:$0xff]  ;;  %v3477_v38 = vld [vmem:[#allocation22 + $0x18] sm:$0xff] }
 0xf15   : > { %v3169_v26 = vpop.permute.xlu1 %3168 }
 0xf16   : > { %v3171_v27 = vmul.f32 %v4826_v25, %v3169_v26  ;;  %v4513_v26 = vpack.c.bf16 %v3477_v38, %v3476_v13 }
 0xf18   : > { %v6193_v45 = vadd.f32 %v3171_v27, %v3166_v40  ;;  %v3572_v40 = vld [vmem:[#allocation25] sm:$0xff]  ;;  %v3573_v27 = vld [vmem:[#allocation25 + $0x8] sm:$0xff] }
 0xf1a   : > { %3174 = vrot.lane.b32.xlu0 %v6193_v45, %s5417_s26 }
 0xf8c   : > { %v6197_v48 = vpop.permute.xlu0 %3174 }
 0xf8d   : > { %v3177_v47 = vsel %vm1142_vm0, %v6197_v48, 0.0 }
 0xf8e   : > { %3178 = vadd.xlane.f32.xlu1 %v3177_v47  ;;  %v3574_v47 = vld [vmem:[#allocation25 + $0x10] sm:$0xff] }
 0xf9f   : > { %3200 = vrot.lane.b32.xlu1 %v4029_v55, %s5425_s10  ;;  %v4516_v55 = vpack.c.bf16 %v3573_v27, %v3572_v40 }
0x101b   : > { %v3179_v28 = vpop.xlane.xlu1 %3178 }
0x101c   : > { %v3180_v29 = vmul.f32 0.03125, %v3179_v28  ;;  %v3575_v28 = vld [vmem:[#allocation25 + $0x18] sm:$0xff] }
0x101e   : > { %v3181_v30 = vsub.f32 %v6193_v45, %v3180_v29  ;;  %v4519_v29 = vpack.c.bf16 %v3575_v28, %v3574_v47 }
0x101f   : > { %v3201_v62 = vpop.permute.xlu1 %3200 }
0x1020   : > { %v3182_v54 = vmul.f32 %v3181_v30, %v3181_v30 }
0x1022   : > { %3184 = vrot.lane.b32.xlu0 %v3182_v54, %s5417_s26 }
0x1094   : > { %v3185_v31 = vpop.permute.xlu0 %3184 }
0x1095   : > { %v3187_v32 = vsel %vm1142_vm0, %v3185_v31, 0.0  ;;  %v4035_v31 = vld [vmem:[#allocation21] ss:$0 sm:$0xff] }
0x1096   : > { %3188 = vadd.xlane.f32.xlu0 %v3187_v32 }
0x10ac   : > { %3210 = vrot.lane.b32.xlu0 %v4030_v33, %s5425_s10 }
0x1123   : > { %v3189_v51 = vpop.xlane.xlu0 %3188 }
0x1124   : > { %v3190_v43 = vmul.f32 0.03125, %v3189_v51 }
0x1126   : > { %v3191_v44 = vadd.f32 1e-05, %v3190_v43 }
0x1127   : > { %v3211_v1 = vpop.permute.xlu0 %3210 }
0x1128   : > { %4827 = vrsqrt.f32 %v3191_v44 }
0x1132   : > { %v4828_v61 = vpop.eup %4827 }
0x1133   : > { %v3193_v63 = vmul.f32 %v4828_v61, %v3181_v30 }
0x1135   : > { %v3203_v2 = vmul.f32 %v3201_v62, %v3193_v63 }
0x1137   : > { %v3213_v3 = vadd.f32 %v3211_v1, %v3203_v2 }
0x1139   : > { %3226 = vrot.lane.b32.xlu1 %v3213_v3, %s5417_s26 }
0x11ab   : > { %v3227_v4 = vpop.permute.xlu1 %3226 }
0x11ac   : > { %4333 = vmatmul.mubr.msk.f32.vlgmr.msra.gmra.mrb[20].mxu0 %vm1142_vm0, %v3227_v4 }
0x11ad   : > { %4362 = vmatprep.mubr.msk.f32.mxu0 %vm5409_vm1, %v5410_v18  ;;  %4505 = vmatpush3.bf16.msra.mxu0 %v4504_v57 }
0x11ae   : > { %4506 = vmatprep.subr.bf16.mxu0 %v5408_v10 }
0x11b1   : > { %4508 = vmatpush3.bf16.msra.mxu0 %v4507_v14 }
0x11b2   : > { %4509 = vmatprep.subr.bf16.mxu0 %v5408_v10 }
0x127f   : > { %v3296_v16 = vpop.f32.mrb[20].mxu0 }
0x1280   : > { %v3297_v17 = vadd.f32 %v4031_v15, %v3296_v16  ;;  %v4334_v19 = vpop.f32.mrb[21].mxu0 }
0x1282   : > { %v3300_v20 = vmax.f32 %v3297_v17, 0.0 }
0x1284   : > { %4352 = vmatmul.mubr.msk.f32.vlgmr.msra.gmra.mrb[20].mxu1 %vm3316_vm3, %v3300_v20 }
0x1285   : > { %4384 = vmatprep.mubr.msk.f32.mxu1 %vm5409_vm1, %v5410_v18  ;;  %4517 = vmatpush3.bf16.msra.mxu1 %v4516_v55 }
0x1286   : > { %4518 = vmatprep.subr.bf16.mxu1 %v5408_v10 }
0x1289   : > { %4520 = vmatpush3.bf16.msra.mxu1 %v4519_v29 }
0x1357   : > { %v3386_v23 = vpop.f32.mrb[20].mxu1 }
0x1358   : > { %v3387_v34 = vadd.f32 %v4033_v59, %v3386_v23  ;;  %v4353_v25 = vpop.f32.mrb[21].mxu1 }
0x135a   : > { %4363 = vmatmul.mubr.msk.f32.vlgmr.msra.gmra.mrb[22].mxu0 %vm1142_vm0, %v3387_v34 }
0x135b   : > { %4511 = vmatpush3.bf16.msra.mxu0 %v4510_v24  ;;  %4373 = vmatprep.mubr.msk.f32.mxu0 %vm5409_vm1, %v5410_v18  ;;  %v4037_v18 = vld [vmem:[#allocation24] ss:$0 sm:$0xff] }
0x135c   : > { %4512 = vmatprep.subr.bf16.mxu0 %v5408_v10  ;;  %v4043_v10 = vld [vmem:[#allocation27] ss:$0 sm:$0xff] }
0x135d   : > { %3660 = vrot.lane.b32.xlu0 %v4043_v10, %s5424_s15 }
0x135f   : > { %4514 = vmatpush3.bf16.msra.mxu0 %v4513_v26 }
0x1362   : > { %4374 = vmatmul.mubr.msk.f32.vlgmr.msra.gmra.mrb[24].mxu0 %vm1142_vm0, %v6197_v48 }
0x13cf   : > { %v3661_v50 = vpop.permute.xlu0 %3660 }
0x142d   : > { %v3470_v30 = vpop.f32.mrb[22].mxu0 }
0x142e   : > { %v4364_v54 = vpop.f32.mrb[23].mxu0  ;;  %v3471_v33 = vadd.f32 %v4035_v31, %v3470_v30 }
0x1435   : > { %v3553_v32 = vpop.f32.mrb[24].mxu0 }
0x1436   : > { %v3554_v35 = vadd.f32 %v4037_v18, %v3553_v32  ;;  %v4375_v36 = vpop.f32.mrb[25].mxu0 }
0x1438   : > { %v3557_v37 = vadd.f32 %v3554_v35, %v3471_v33 }
0x143a   : > { %v4039_v39 = vmul.f32 -1.442695, %v3557_v37 }
0x143c   : > { %4829 = vpow2.f32 %v4039_v39 }
0x1446   : > { %v4830_v41 = vpop.eup %4829 }
0x1447   : > { %v3561_v42 = vadd.f32 1.0, %v4830_v41 }
0x1449   : > { %4831 = vrcp.f32 %v3561_v42 }
0x1453   : > { %v4832_v51 = vpop.eup %4831 }
0x1454   : > { %v3571_v43 = vmul.f32 %v4832_v51, %v6197_v48  ;;  %v4040_v48 = vadd.f32 -0.1, %v3557_v37 }
0x1456   : > { %4385 = vmatmul.mubr.msk.f32.vlgmr.msra.gmra.mrb[22].mxu1 %vm1142_vm0, %v3571_v43  ;;  %v4041_v58 = vmul.f32 -1.442695, %v4040_v48 }
0x1529   : > { %v3645_v44 = vpop.f32.mrb[22].mxu1 }
0x152a   : > { %3650 = vrot.lane.b32.xlu1 %v3645_v44, %s5424_s15  ;;  %v4386_v46 = vpop.f32.mrb[23].mxu1 }
0x159c   : > { %v3651_v49 = vpop.permute.xlu1 %3650 }
0x159d   : > { %v3653_v52 = vadd.f32 %v3651_v49, %v3471_v33 }
0x159f   : > { %v3663_v53 = vadd.f32 %v3661_v50, %v3653_v52 }
0x15a1   : > { %4833 = vtanh.f32 %v3663_v53 }
0x15a2   : > { %4835 = vpow2.f32 %v4041_v58 }
0x15ab   : > { %v4834_v56 = vpop.eup %4833 }
0x15ac   : > { %3668 = vrot.lane.b32.xlu1 %v4834_v56, %s5417_s26  ;;  %v4836_v60 = vpop.eup %4835 }
0x15ad   : > { %v3568_v61 = vadd.f32 1.0, %v4836_v60 }
0x15af   : > { %4837 = vrcp.f32 %v3568_v61 }
0x15b9   : > { %v4838_v62 = vpop.eup %4837 }
0x15ba   : > { %v3665_v63 = vsub.f32 1.0, %v4838_v62 }
0x15bc   : > { %v3666_v1 = vmul.f32 %v3665_v63, %v6193_v45 }
0x161e   : > { %v3669_v0 = vpop.permute.xlu1 %3668 }
0x161f   : > { %v3671_v2 = vmul.f32 %v4838_v62, %v3669_v0 }
0x1621   : > { %v3672_v3 = vadd.f32 %v3671_v2, %v3666_v1 }
0x1623   : > { %3674 = vrot.lane.b32.xlu0 %v3672_v3, %s5417_s26 }
0x1695   : > { %v3675_v4 = vpop.permute.xlu0 %3674 }
0x1696   : > { %3677 = vst.msk [vmem:[%s1139_s16] sm:$0xff] %vm1142_vm0, %v3675_v4 }
0x1697 PF: > { %s78_s7 = sadd.s32 1, %s5358_s7  }
0x1698   : > { %p75_p5 = scmp.ge.s32.totalorder %s78_s7, 4  }
0x169a   :  { %77 = sbr.rel (!%p75_p5) target bundleno = 54 (0x36), region = 267 }
0x16a1   :  { %3697 = vsyncpa [#allocation3], 1 }
0x16a2   :  { %3699 = vsyncpa [#allocation3 + $0x1], 1 }
0x16a3   :  { %3700 = vsyncpa [#allocation5], 1 }
0x16a4   :  { %3701 = vsyncpa [#allocation8], 1 }
0x16a5   :  { %3702 = vsyncpa [#allocation11], 1 }
0x16a6   :  { %3703 = vsyncpa [#allocation14], 1 }
0x16a7   :  { %3704 = vsyncpa [#allocation17], 1 }
0x16a8   :  { %3705 = vsyncpa [#allocation20], 1 }
0x16a9   :  { %3706 = vsyncpa [#allocation23], 1 }
0x16aa   :  { %3707 = vsyncpa [#allocation26], 1 }

</bundles_post_ra>
